<compile_context>
chip_gen: v5e
topology: v5e:2x2
jax: 0.10.0
libtpu: 0.0.40
codegen_flags: <defaults>
</compile_context>

<pallas_src>
import jax
import jax.numpy as jnp
from jax import lax
from jax.experimental import pallas as pl
from jax.experimental.pallas import tpu as pltpu

_LANE = 128      # vreg lane width
_SUBLANE = 8     # f32 sublane count


def _round_up(x, m):
    return ((x + m - 1) // m) * m


def _softplus(x):
    # numerically-stable softplus, matches F.softplus(beta=1) in f32
    return jnp.maximum(x, 0.0) + jnp.log1p(jnp.exp(-jnp.abs(x)))


def make_mlp_kernel(n_linear, output_dim):
    """Fused MLP kernel.

    Ref layout: (x, w0, b0, w1, b1, ..., out).
    All feature dims are pre-padded to multiples of 128 lanes; the mu /
    softplus(sigma) selection is done with a per-lane mask (VPU select)
    rather than lane slicing, so the single output store is unmasked.
    """

    def kernel(*refs):
        x_ref = refs[0]
        wb_refs = refs[1:1 + 2 * n_linear]
        out_ref = refs[1 + 2 * n_linear]

        h = x_ref[...]                              # (TM, in_pad) f32
        for li in range(n_linear):
            w = wb_refs[2 * li][...]                # (fan_in_pad, fan_out_pad)
            b = wb_refs[2 * li + 1][...]            # (1, fan_out_pad) f32
            # MXU matmul, f32 accumulation (weights may be bf16).
            h = jnp.dot(h.astype(w.dtype), w,
                        preferred_element_type=jnp.float32) + b
            if li < n_linear - 1:
                h = jnp.maximum(h, 0.0)             # ReLU in f32 on the VPU

        # Lane mask: cols < output_dim -> mu (identity), else softplus(sigma).
        col = lax.broadcasted_iota(jnp.int32, h.shape, 1)
        out_ref[...] = jnp.where(col < output_dim, h, _softplus(h))

    return kernel


def init_gaussian_mlp_params(key, input_dim, width, depth, output_dim):
    """PyTorch-nn.Linear-style init: U(-1/sqrt(fan_in), +1/sqrt(fan_in)).
    Weights stored (fan_in, fan_out)."""
    dims = [input_dim] + [width] * depth + [2 * output_dim]
    params = []
    for li in range(len(dims) - 1):
        fan_in, fan_out = dims[li], dims[li + 1]
        key, kw, kb = jax.random.split(key, 3)
        bound = 1.0 / float(fan_in) ** 0.5
        w = jax.random.uniform(kw, (fan_in, fan_out), jnp.float32, -bound, bound)
        b = jax.random.uniform(kb, (fan_out,), jnp.float32, -bound, bound)
        params.append((w, b))
    return params


def gaussian_mlp_forward(x, params, *, input_dim, output_dim, depth,
                         flatten_image=True, weight_dtype=jnp.float32,
                         batch_tile=256):
    """Fused Pallas forward for GaussianMLP.  Returns (mu, sigma)."""
    if flatten_image:
        x = x.reshape(-1, input_dim)
    if x.ndim == 1:
        x = x[None, :]
    x = x.astype(jnp.float32)
    B = x.shape[0]
    n_linear = depth + 1
    assert len(params) == n_linear

    # ---- lane/sublane padding (zero-pad -> numerics unchanged) ------------
    in_pad = _round_up(input_dim, _LANE)
    out_pad = _round_up(2 * output_dim, _LANE)

    tm = min(batch_tile, _round_up(B, _SUBLANE))
    tm = _round_up(tm, _SUBLANE)
    b_pad = _round_up(B, tm)
    grid = (b_pad // tm,)

    x_p = jnp.pad(x, ((0, b_pad - B), (0, in_pad - input_dim)))

    wb_args = []
    for (w, b) in params:
        fi, fo = w.shape
        fi_p, fo_p = _round_up(fi, _LANE), _round_up(fo, _LANE)
        w_p = jnp.pad(w, ((0, fi_p - fi), (0, fo_p - fo))).astype(weight_dtype)
        b_p = jnp.pad(b, (0, fo_p - fo)).astype(jnp.float32).reshape(1, -1)
        wb_args += [w_p, b_p]

    # ---- VMEM budget (conservative: double-buffer everything + headroom) --
    est = 2 * (tm * in_pad * 4 + tm * out_pad * 4)
    est += 2 * sum(int(a.size) * a.dtype.itemsize for a in wb_args)
    est += 4 << 20
    vmem_limit = int(min(64 << 20, max(32 << 20, est)))   # cap for v7x (64 MiB)

    kernel = make_mlp_kernel(n_linear, output_dim)
    out_shape = jax.ShapeDtypeStruct((b_pad, out_pad), jnp.float32)

    def _const_spec(shape, single_buffer):
        # Weights/biases are grid-invariant; single-buffer them to halve VMEM.
        if single_buffer:
            return pl.BlockSpec(shape, lambda i: (0, 0),
                                pipeline_mode=pl.Buffered(1))
        return pl.BlockSpec(shape, lambda i: (0, 0))

    def _call(single_buffer_weights):
        in_specs = [pl.BlockSpec((tm, in_pad), lambda i: (i, 0))]
        for a in wb_args:
            in_specs.append(_const_spec(a.shape, single_buffer_weights))
        out_spec = pl.BlockSpec((tm, out_pad), lambda i: (i, 0))
        return pl.pallas_call(
            kernel,
            grid=grid,
            in_specs=in_specs,
            out_specs=out_spec,
            out_shape=out_shape,
            compiler_params=pltpu.CompilerParams(
                dimension_semantics=("parallel",),
                vmem_limit_bytes=vmem_limit),
        )(x_p, *wb_args)

    try:
        out = _call(True)
    except Exception:       # pragma: no cover - pipeline_mode unsupported path
        out = _call(False)

    mu = out[:B, :output_dim]
    sigma = out[:B, output_dim:2 * output_dim]
    return mu, sigma


def _reference_forward(x, params, *, input_dim, output_dim, flatten_image=True):
    if flatten_image:
        x = x.reshape(-1, input_dim)
    h = x.astype(jnp.float32)
    n_linear = len(params)
    for li, (w, b) in enumerate(params):
        h = h @ w + b
        if li < n_linear - 1:
            h = jnp.maximum(h, 0.0)
    mu = h[:, :output_dim]
    sigma = jax.nn.softplus(h[:, output_dim:])
    return mu, sigma


if __name__ == "__main__":
    # Module config (flatten_image=True -> input is an NCHW image batch)
    B, C, H, W = 2, 4, 16, 16
    input_dim = C * H * W          # 1024
    width = 32
    depth = 2
    output_dim = 8

    key = jax.random.PRNGKey(0)
    key, kx = jax.random.split(key)
    x = jax.random.normal(kx, (B, C, H, W), jnp.float32)

    params = init_gaussian_mlp_params(key, input_dim, width, depth, output_dim)

    # f32 path at the spec shapes.
    mu, sigma = gaussian_mlp_forward(
        x, params, input_dim=input_dim, output_dim=output_dim, depth=depth,
        flatten_image=True)
    jax.block_until_ready((mu, sigma))

    mu_ref, sigma_ref = _reference_forward(
        x, params, input_dim=input_dim, output_dim=output_dim,
        flatten_image=True)

    assert mu.shape == (B, output_dim) and sigma.shape == (B, output_dim)
    assert jnp.allclose(mu, mu_ref, atol=1e-5, rtol=1e-5)
    assert jnp.allclose(sigma, sigma_ref, atol=1e-5, rtol=1e-5)
    # softplus may underflow to exactly 0.0 in f32, so assert non-negativity.
    assert bool(jnp.all(sigma >= 0.0))

    # Exercise the batch-tiled "parallel" grid path (grid = (2,)).
    key, kx2 = jax.random.split(key)
    x_big = jax.random.normal(kx2, (64, C, H, W), jnp.float32)
    mu_b, sigma_b = gaussian_mlp_forward(
        x_big, params, input_dim=input_dim, output_dim=output_dim, depth=depth,
        flatten_image=True, batch_tile=32)
    mu_br, sigma_br = _reference_forward(
        x_big, params, input_dim=input_dim, output_dim=output_dim,
        flatten_image=True)
    assert jnp.allclose(mu_b, mu_br, atol=1e-5, rtol=1e-5)
    assert jnp.allclose(sigma_b, sigma_br, atol=1e-5, rtol=1e-5)

    # bf16-weight path (f32 accumulation) — v6e/v7x option; sanity only.
    mu_h, sigma_h = gaussian_mlp_forward(
        x, params, input_dim=input_dim, output_dim=output_dim, depth=depth,
        flatten_image=True, weight_dtype=jnp.bfloat16)
    jax.block_until_ready((mu_h, sigma_h))
    assert mu_h.shape == (B, output_dim) and sigma_h.shape == (B, output_dim)
    assert bool(jnp.all(jnp.isfinite(mu_h)))
    assert bool(jnp.all(jnp.isfinite(sigma_h)))
    assert bool(jnp.all(sigma_h >= 0.0))

    print("KERNEL_OK")
</pallas_src>

<mosaic_0001>
module attributes {stable_mosaic.version = 11 : i64} {
  func.func @kernel(%arg0: i32, %arg1: memref<8x1024xf32, #tpu.memory_space<vmem>>, %arg2: memref<1024x128xf32, #tpu.memory_space<vmem>>, %arg3: memref<1x128xf32, #tpu.memory_space<vmem>>, %arg4: memref<128x128xf32, #tpu.memory_space<vmem>>, %arg5: memref<1x128xf32, #tpu.memory_space<vmem>>, %arg6: memref<128x128xf32, #tpu.memory_space<vmem>>, %arg7: memref<1x128xf32, #tpu.memory_space<vmem>>, %arg8: memref<8x128xf32, #tpu.memory_space<vmem>>) attributes {dimension_semantics = [#tpu.dimension_semantics<parallel>], iteration_bounds = array<i64: 1>, scalar_prefetch = 0 : i64, scratch_operands = 0 : i64, tpu.core_type = #tpu.core_type<tc>, window_params = [{transform_indices = @transform_0, window_bounds = array<i64: 8, 1024>}, {pipeline_mode = #tpu.pipeline_mode<synchronous>, transform_indices = @transform_1, window_bounds = array<i64: 1024, 128>}, {pipeline_mode = #tpu.pipeline_mode<synchronous>, transform_indices = @transform_2, window_bounds = array<i64: 1, 128>}, {pipeline_mode = #tpu.pipeline_mode<synchronous>, transform_indices = @transform_3, window_bounds = array<i64: 128, 128>}, {pipeline_mode = #tpu.pipeline_mode<synchronous>, transform_indices = @transform_4, window_bounds = array<i64: 1, 128>}, {pipeline_mode = #tpu.pipeline_mode<synchronous>, transform_indices = @transform_5, window_bounds = array<i64: 128, 128>}, {pipeline_mode = #tpu.pipeline_mode<synchronous>, transform_indices = @transform_6, window_bounds = array<i64: 1, 128>}, {transform_indices = @transform_7, window_bounds = array<i64: 8, 128>}]} {
    %c0 = arith.constant 0 : index
    %c0_0 = arith.constant 0 : index
    %0 = vector.load %arg1[%c0, %c0_0] : memref<8x1024xf32, #tpu.memory_space<vmem>>, vector<8x1024xf32>
    %c0_1 = arith.constant 0 : index
    %c0_2 = arith.constant 0 : index
    %1 = vector.load %arg2[%c0_1, %c0_2] : memref<1024x128xf32, #tpu.memory_space<vmem>>, vector<1024x128xf32>
    %c0_3 = arith.constant 0 : index
    %c0_4 = arith.constant 0 : index
    %2 = vector.load %arg3[%c0_3, %c0_4] : memref<1x128xf32, #tpu.memory_space<vmem>>, vector<1x128xf32>
    %cst = arith.constant dense<0.000000e+00> : vector<8x128xf32>
    %3 = tpu.matmul %0, %1, %cst {dimension_numbers = #tpu.dot_dimension_numbers<[1], [0], [0], [1], [0, 0, 1, 1], [], []>} : vector<8x1024xf32>, vector<1024x128xf32>, vector<8x128xf32> -> vector<8x128xf32>
    %4 = vector.broadcast %2 : vector<1x128xf32> to vector<8x128xf32>
    %5 = arith.addf %3, %4 : vector<8x128xf32>
    %cst_5 = arith.constant 0.000000e+00 : f32
    %6 = vector.broadcast %cst_5 : f32 to vector<8x128xf32>
    %7 = arith.maximumf %5, %6 : vector<8x128xf32>
    %c0_6 = arith.constant 0 : index
    %c0_7 = arith.constant 0 : index
    %8 = vector.load %arg4[%c0_6, %c0_7] : memref<128x128xf32, #tpu.memory_space<vmem>>, vector<128x128xf32>
    %c0_8 = arith.constant 0 : index
    %c0_9 = arith.constant 0 : index
    %9 = vector.load %arg5[%c0_8, %c0_9] : memref<1x128xf32, #tpu.memory_space<vmem>>, vector<1x128xf32>
    %cst_10 = arith.constant dense<0.000000e+00> : vector<8x128xf32>
    %10 = tpu.matmul %7, %8, %cst_10 {dimension_numbers = #tpu.dot_dimension_numbers<[1], [0], [0], [1], [0, 0, 1, 1], [], []>} : vector<8x128xf32>, vector<128x128xf32>, vector<8x128xf32> -> vector<8x128xf32>
    %11 = vector.broadcast %9 : vector<1x128xf32> to vector<8x128xf32>
    %12 = arith.addf %10, %11 : vector<8x128xf32>
    %cst_11 = arith.constant 0.000000e+00 : f32
    %13 = vector.broadcast %cst_11 : f32 to vector<8x128xf32>
    %14 = arith.maximumf %12, %13 : vector<8x128xf32>
    %c0_12 = arith.constant 0 : index
    %c0_13 = arith.constant 0 : index
    %15 = vector.load %arg6[%c0_12, %c0_13] : memref<128x128xf32, #tpu.memory_space<vmem>>, vector<128x128xf32>
    %c0_14 = arith.constant 0 : index
    %c0_15 = arith.constant 0 : index
    %16 = vector.load %arg7[%c0_14, %c0_15] : memref<1x128xf32, #tpu.memory_space<vmem>>, vector<1x128xf32>
    %cst_16 = arith.constant dense<0.000000e+00> : vector<8x128xf32>
    %17 = tpu.matmul %14, %15, %cst_16 {dimension_numbers = #tpu.dot_dimension_numbers<[1], [0], [0], [1], [0, 0, 1, 1], [], []>} : vector<8x128xf32>, vector<128x128xf32>, vector<8x128xf32> -> vector<8x128xf32>
    %18 = vector.broadcast %16 : vector<1x128xf32> to vector<8x128xf32>
    %19 = arith.addf %17, %18 : vector<8x128xf32>
    %20 = tpu.iota {dimensions = array<i32: 1>} : vector<8x128xi32>
    %c8_i32 = arith.constant 8 : i32
    %21 = vector.broadcast %c8_i32 : i32 to vector<8x128xi32>
    %22 = arith.cmpi slt, %20, %21 : vector<8x128xi32>
    %cst_17 = arith.constant 0.000000e+00 : f32
    %23 = vector.broadcast %cst_17 : f32 to vector<8x128xf32>
    %24 = arith.maximumf %19, %23 : vector<8x128xf32>
    %25 = math.absf %19 : vector<8x128xf32>
    %cst_18 = arith.constant 0.000000e+00 : f32
    %26 = vector.broadcast %cst_18 : f32 to vector<8x128xf32>
    %27 = arith.subf %26, %25 : vector<8x128xf32>
    %28 = math.exp %27 : vector<8x128xf32>
    %29 = math.log1p %28 : vector<8x128xf32>
    %30 = arith.addf %24, %29 : vector<8x128xf32>
    %31 = arith.select %22, %19, %30 : vector<8x128xi1>, vector<8x128xf32>
    %c0_19 = arith.constant 0 : index
    %c0_20 = arith.constant 0 : index
    %32 = vector.load %arg8[%c0_19, %c0_20] : memref<8x128xf32, #tpu.memory_space<vmem>>, vector<8x128xf32>
    tpu.vector_store %arg8[%c0_19, %c0_20], %31 {strides = array<i32>} : memref<8x128xf32, #tpu.memory_space<vmem>>, vector<8x128xf32>,
    return
  }
  func.func @transform_0(%arg0: i32) -> (i32, i32) {
    %c0_i32 = arith.constant 0 : i32
    %c0_i32_0 = arith.constant 0 : i32
    return %arg0, %c0_i32 : i32, i32
  }
  func.func @transform_1(%arg0: i32) -> (i32, i32) {
    %c0_i32 = arith.constant 0 : i32
    %c0_i32_0 = arith.constant 0 : i32
    %c0_i32_1 = arith.constant 0 : i32
    return %c0_i32, %c0_i32_0 : i32, i32
  }
  func.func @transform_2(%arg0: i32) -> (i32, i32) {
    %c0_i32 = arith.constant 0 : i32
    %c0_i32_0 = arith.constant 0 : i32
    %c0_i32_1 = arith.constant 0 : i32
    return %c0_i32, %c0_i32_0 : i32, i32
  }
  func.func @transform_3(%arg0: i32) -> (i32, i32) {
    %c0_i32 = arith.constant 0 : i32
    %c0_i32_0 = arith.constant 0 : i32
    %c0_i32_1 = arith.constant 0 : i32
    return %c0_i32, %c0_i32_0 : i32, i32
  }
  func.func @transform_4(%arg0: i32) -> (i32, i32) {
    %c0_i32 = arith.constant 0 : i32
    %c0_i32_0 = arith.constant 0 : i32
    %c0_i32_1 = arith.constant 0 : i32
    return %c0_i32, %c0_i32_0 : i32, i32
  }
  func.func @transform_5(%arg0: i32) -> (i32, i32) {
    %c0_i32 = arith.constant 0 : i32
    %c0_i32_0 = arith.constant 0 : i32
    %c0_i32_1 = arith.constant 0 : i32
    return %c0_i32, %c0_i32_0 : i32, i32
  }
  func.func @transform_6(%arg0: i32) -> (i32, i32) {
    %c0_i32 = arith.constant 0 : i32
    %c0_i32_0 = arith.constant 0 : i32
    %c0_i32_1 = arith.constant 0 : i32
    return %c0_i32, %c0_i32_0 : i32, i32
  }
  func.func @transform_7(%arg0: i32) -> (i32, i32) {
    %c0_i32 = arith.constant 0 : i32
    %c0_i32_0 = arith.constant 0 : i32
    return %arg0, %c0_i32 : i32, i32
  }
}

module attributes {stable_mosaic.version = 11 : i64} {
  func.func @kernel(%arg0: i32, %arg1: memref<8x1024xf32, #tpu.memory_space<vmem>>, %arg2: memref<1024x128xf32, #tpu.memory_space<vmem>>, %arg3: memref<1x128xf32, #tpu.memory_space<vmem>>, %arg4: memref<128x128xf32, #tpu.memory_space<vmem>>, %arg5: memref<1x128xf32, #tpu.memory_space<vmem>>, %arg6: memref<128x128xf32, #tpu.memory_space<vmem>>, %arg7: memref<1x128xf32, #tpu.memory_space<vmem>>, %arg8: memref<8x128xf32, #tpu.memory_space<vmem>>) attributes {dimension_semantics = [#tpu.dimension_semantics<parallel>], iteration_bounds = array<i64: 1>, scalar_prefetch = 0 : i64, scratch_operands = 0 : i64, tpu.core_type = #tpu.core_type<tc>, window_params = [{transform_indices = @transform_0, window_bounds = array<i64: 8, 1024>}, {pipeline_mode = #tpu.pipeline_mode<synchronous>, transform_indices = @transform_1, window_bounds = array<i64: 1024, 128>}, {pipeline_mode = #tpu.pipeline_mode<synchronous>, transform_indices = @transform_2, window_bounds = array<i64: 1, 128>}, {pipeline_mode = #tpu.pipeline_mode<synchronous>, transform_indices = @transform_3, window_bounds = array<i64: 128, 128>}, {pipeline_mode = #tpu.pipeline_mode<synchronous>, transform_indices = @transform_4, window_bounds = array<i64: 1, 128>}, {pipeline_mode = #tpu.pipeline_mode<synchronous>, transform_indices = @transform_5, window_bounds = array<i64: 128, 128>}, {pipeline_mode = #tpu.pipeline_mode<synchronous>, transform_indices = @transform_6, window_bounds = array<i64: 1, 128>}, {transform_indices = @transform_7, window_bounds = array<i64: 8, 128>}]} {
    %c0 = arith.constant 0 : index
    %c0_0 = arith.constant 0 : index
    %0 = vector.load %arg1[%c0, %c0_0] : memref<8x1024xf32, #tpu.memory_space<vmem>>, vector<8x1024xf32>
    %c0_1 = arith.constant 0 : index
    %c0_2 = arith.constant 0 : index
    %1 = vector.load %arg2[%c0_1, %c0_2] : memref<1024x128xf32, #tpu.memory_space<vmem>>, vector<1024x128xf32>
    %c0_3 = arith.constant 0 : index
    %c0_4 = arith.constant 0 : index
    %2 = vector.load %arg3[%c0_3, %c0_4] : memref<1x128xf32, #tpu.memory_space<vmem>>, vector<1x128xf32>
    %cst = arith.constant dense<0.000000e+00> : vector<8x128xf32>
    %3 = tpu.matmul %0, %1, %cst {dimension_numbers = #tpu.dot_dimension_numbers<[1], [0], [0], [1], [0, 0, 1, 1], [], []>} : vector<8x1024xf32>, vector<1024x128xf32>, vector<8x128xf32> -> vector<8x128xf32>
    %4 = vector.broadcast %2 : vector<1x128xf32> to vector<8x128xf32>
    %5 = arith.addf %3, %4 : vector<8x128xf32>
    %cst_5 = arith.constant 0.000000e+00 : f32
    %6 = vector.broadcast %cst_5 : f32 to vector<8x128xf32>
    %7 = arith.maximumf %5, %6 : vector<8x128xf32>
    %c0_6 = arith.constant 0 : index
    %c0_7 = arith.constant 0 : index
    %8 = vector.load %arg4[%c0_6, %c0_7] : memref<128x128xf32, #tpu.memory_space<vmem>>, vector<128x128xf32>
    %c0_8 = arith.constant 0 : index
    %c0_9 = arith.constant 0 : index
    %9 = vector.load %arg5[%c0_8, %c0_9] : memref<1x128xf32, #tpu.memory_space<vmem>>, vector<1x128xf32>
    %cst_10 = arith.constant dense<0.000000e+00> : vector<8x128xf32>
    %10 = tpu.matmul %7, %8, %cst_10 {dimension_numbers = #tpu.dot_dimension_numbers<[1], [0], [0], [1], [0, 0, 1, 1], [], []>} : vector<8x128xf32>, vector<128x128xf32>, vector<8x128xf32> -> vector<8x128xf32>
    %11 = vector.broadcast %9 : vector<1x128xf32> to vector<8x128xf32>
    %12 = arith.addf %10, %11 : vector<8x128xf32>
    %cst_11 = arith.constant 0.000000e+00 : f32
    %13 = vector.broadcast %cst_11 : f32 to vector<8x128xf32>
    %14 = arith.maximumf %12, %13 : vector<8x128xf32>
    %c0_12 = arith.constant 0 : index
    %c0_13 = arith.constant 0 : index
    %15 = vector.load %arg6[%c0_12, %c0_13] : memref<128x128xf32, #tpu.memory_space<vmem>>, vector<128x128xf32>
    %c0_14 = arith.constant 0 : index
    %c0_15 = arith.constant 0 : index
    %16 = vector.load %arg7[%c0_14, %c0_15] : memref<1x128xf32, #tpu.memory_space<vmem>>, vector<1x128xf32>
    %cst_16 = arith.constant dense<0.000000e+00> : vector<8x128xf32>
    %17 = tpu.matmul %14, %15, %cst_16 {dimension_numbers = #tpu.dot_dimension_numbers<[1], [0], [0], [1], [0, 0, 1, 1], [], []>} : vector<8x128xf32>, vector<128x128xf32>, vector<8x128xf32> -> vector<8x128xf32>
    %18 = vector.broadcast %16 : vector<1x128xf32> to vector<8x128xf32>
    %19 = arith.addf %17, %18 : vector<8x128xf32>
    %20 = tpu.iota {dimensions = array<i32: 1>} : vector<8x128xi32>
    %c8_i32 = arith.constant 8 : i32
    %21 = vector.broadcast %c8_i32 : i32 to vector<8x128xi32>
    %22 = arith.cmpi slt, %20, %21 : vector<8x128xi32>
    %cst_17 = arith.constant 0.000000e+00 : f32
    %23 = vector.broadcast %cst_17 : f32 to vector<8x128xf32>
    %24 = arith.maximumf %19, %23 : vector<8x128xf32>
    %25 = math.absf %19 : vector<8x128xf32>
    %cst_18 = arith.constant 0.000000e+00 : f32
    %26 = vector.broadcast %cst_18 : f32 to vector<8x128xf32>
    %27 = arith.subf %26, %25 : vector<8x128xf32>
    %28 = math.exp %27 : vector<8x128xf32>
    %29 = math.log1p %28 : vector<8x128xf32>
    %30 = arith.addf %24, %29 : vector<8x128xf32>
    %31 = arith.select %22, %19, %30 : vector<8x128xi1>, vector<8x128xf32>
    %c0_19 = arith.constant 0 : index
    %c0_20 = arith.constant 0 : index
    %32 = vector.load %arg8[%c0_19, %c0_20] : memref<8x128xf32, #tpu.memory_space<vmem>>, vector<8x128xf32>
    tpu.vector_store %arg8[%c0_19, %c0_20], %31 {strides = array<i32>} : memref<8x128xf32, #tpu.memory_space<vmem>>, vector<8x128xf32>,
    return
  }
  func.func @transform_0(%arg0: i32) -> (i32, i32) {
    %c0_i32 = arith.constant 0 : i32
    %c0_i32_0 = arith.constant 0 : i32
    return %arg0, %c0_i32 : i32, i32
  }
  func.func @transform_1(%arg0: i32) -> (i32, i32) {
    %c0_i32 = arith.constant 0 : i32
    %c0_i32_0 = arith.constant 0 : i32
    %c0_i32_1 = arith.constant 0 : i32
    return %c0_i32, %c0_i32_0 : i32, i32
  }
  func.func @transform_2(%arg0: i32) -> (i32, i32) {
    %c0_i32 = arith.constant 0 : i32
    %c0_i32_0 = arith.constant 0 : i32
    %c0_i32_1 = arith.constant 0 : i32
    return %c0_i32, %c0_i32_0 : i32, i32
  }
  func.func @transform_3(%arg0: i32) -> (i32, i32) {
    %c0_i32 = arith.constant 0 : i32
    %c0_i32_0 = arith.constant 0 : i32
    %c0_i32_1 = arith.constant 0 : i32
    return %c0_i32, %c0_i32_0 : i32, i32
  }
  func.func @transform_4(%arg0: i32) -> (i32, i32) {
    %c0_i32 = arith.constant 0 : i32
    %c0_i32_0 = arith.constant 0 : i32
    %c0_i32_1 = arith.constant 0 : i32
    return %c0_i32, %c0_i32_0 : i32, i32
  }
  func.func @transform_5(%arg0: i32) -> (i32, i32) {
    %c0_i32 = arith.constant 0 : i32
    %c0_i32_0 = arith.constant 0 : i32
    %c0_i32_1 = arith.constant 0 : i32
    return %c0_i32, %c0_i32_0 : i32, i32
  }
  func.func @transform_6(%arg0: i32) -> (i32, i32) {
    %c0_i32 = arith.constant 0 : i32
    %c0_i32_0 = arith.constant 0 : i32
    %c0_i32_1 = arith.constant 0 : i32
    return %c0_i32, %c0_i32_0 : i32, i32
  }
  func.func @transform_7(%arg0: i32) -> (i32, i32) {
    %c0_i32 = arith.constant 0 : i32
    %c0_i32_0 = arith.constant 0 : i32
    return %arg0, %c0_i32 : i32, i32
  }
}

</mosaic_0001>

<bundles_post_ra>
// kernel: tpu_custom_call.1
= control target key start
LH: loop header
LB: loop body
LE: loop exit
PB: predicated region body
PF: predicated region fallthrough
CT: control target
= control target key end

     0   :  { %12 = vsyncpa [#allocation3], 0  ;;  %s722_s0 = inlined_call_operand.hbm [shape: f32[8,1024], index: 0, kind: input, shape index: {}]   ;;  %s723_s1 = inlined_call_operand.hbm [shape: f32[1024,128], index: 1, kind: input, shape index: {}]   ;;  %s724_s2 = inlined_call_operand.vmem [shape: f32[1,128], index: 2, kind: input, shape index: {}]   ;;  %s725_s3 = inlined_call_operand.hbm [shape: f32[128,128], index: 3, kind: input, shape index: {}]   ;;  %s726_s4 = inlined_call_operand.vmem [shape: f32[1,128], index: 4, kind: input, shape index: {}]   ;;  %s727_s5 = inlined_call_operand.hbm [shape: f32[128,128], index: 5, kind: input, shape index: {}]   ;;  %s728_s6 = inlined_call_operand.vmem [shape: f32[1,128], index: 6, kind: input, shape index: {}]   ;;  %s729_s7 = inlined_call_operand.hbm [shape: f32[8,128], index: 7, kind: output, shape index: {}]  }
   0x1   :  { %13 = vsyncpa [#allocation6], 0 }
   0x2   :  { %14 = vsyncpa [#allocation9], 0  ;;  %s31_s26 = sshll.u32 %s723_s1, 4  ;;  %s32_s26 = int_to_ptr.hbm [resolvable:$true] %s31_s26 }
   0x3   :  { %15 = vsyncpa [#allocation4], 0  ;;  %s651_s27 = smov [#allocation5]   ;;  %s21_s8 = sshll.u32 %s722_s0, 4  ;;  %s22_s8 = int_to_ptr.hbm [resolvable:$true] %s21_s8 }
   0x4   :  { %s33_s28 = sshll.u32 %s651_s27, 4  ;;  %s652_s9 = smov 128   ;;  %s34_s28 = int_to_ptr.vmem [resolvable:$true] %s33_s28 }
   0x5   :  { %s653_s10 = smov 8   ;;  %s654_s11 = smov [#allocation2]  }
   0x6   :  { %39 = dma.hbm_to_vmem [thread:$0]  %s32_s26, 16384, %s34_s28, [#allocation6], %s652_s9, %s652_s9, %s653_s10  }
   0x7   :  { %s23_s12 = sshll.u32 %s654_s11, 4  ;;  %s46_s15 = sshll.u32 %s725_s3, 4  ;;  %s24_s12 = int_to_ptr.vmem [resolvable:$true] %s23_s12  ;;  %s47_s15 = int_to_ptr.hbm [resolvable:$true] %s46_s15 }
   0x8   :  { %26 = dma.hbm_to_vmem [thread:$0]  %s22_s8, 1024, %s24_s12, [#allocation3]  }
   0x9   :  { %s61_s17 = sshll.u32 %s727_s5, 4  ;;  %s655_s18 = smov [#allocation7]   ;;  %s62_s17 = int_to_ptr.hbm [resolvable:$true] %s61_s17 }
   0xa   :  { %s48_s19 = sshll.u32 %s655_s18, 4  ;;  %s656_s0 = smov [#allocation8]   ;;  %s49_s19 = int_to_ptr.vmem [resolvable:$true] %s48_s19 }
   0xb   :  { %54 = dma.hbm_to_vmem [thread:$0]  %s47_s15, 2048, %s49_s19, [#allocation6], %s652_s9, %s652_s9, %s653_s10  }
   0xc   :  { %s63_s20 = sshll.u32 %s656_s0, 4  ;;  %s64_s20 = int_to_ptr.vmem [resolvable:$true] %s63_s20 }
   0xd   :  { %69 = dma.hbm_to_vmem [thread:$0]  %s62_s17, 2048, %s64_s20, [#allocation9], %s652_s9, %s652_s9, %s653_s10  }
   0xe   :  { %643 = dma.done.wait [#allocation3], 1024  }
   0xf   :  { %644 = vsyncadd [#allocation3], 4294966272 }
  0x10   :  { %645 = dma.done.wait [#allocation6], 18432  }
  0x11   :  { %646 = vsyncadd [#allocation6], 4294948864 }
  0x12   :  { %647 = dma.done.wait [#allocation9], 2048  }
  0x13   :  { %648 = vsyncadd [#allocation9], 4294965248  ;;  %v143_v0 = vld [vmem:[#allocation5 + $0x178] sm:$0xff]  ;;  %v142_v2 = vld [vmem:[#allocation5 + $0x170] sm:$0xff]  ;;  %s497_s26 = sshll.u32 %s729_s7, 4  ;;  %s498_s26 = int_to_ptr.hbm [resolvable:$true] %s497_s26 }
  0x14   :  { %v111_v1 = vld [vmem:[#allocation5 + $0x78] sm:$0xff]  ;;  %268 = vmatpush.msra.mxu2 %v143_v0  ;;  %v110_v4 = vld [vmem:[#allocation5 + $0x70] sm:$0xff]  ;;  %v141_v6 = vld [vmem:[#allocation5 + $0x168] sm:$0xff] }
  0x15   :  { %228 = vmatpush.msra.mxu0 %v111_v1  ;;  %v159_v3 = vld [vmem:[#allocation5 + $0x1f8] sm:$0xff]  ;;  %v158_v7 = vld [vmem:[#allocation5 + $0x1f0] sm:$0xff]  ;;  %v109_v8 = vld [vmem:[#allocation5 + $0x68] sm:$0xff] }
  0x16   :  { %v127_v5 = vld [vmem:[#allocation5 + $0xf8] sm:$0xff]  ;;  %288 = vmatpush.msra.mxu3 %v159_v3  ;;  %269 = vmatpush.msra.mxu2 %v142_v2  ;;  %v126_v9 = vld [vmem:[#allocation5 + $0xf0] sm:$0xff]  ;;  %v157_v10 = vld [vmem:[#allocation5 + $0x1e8] sm:$0xff] }
  0x17   :  { %248 = vmatpush.msra.mxu1 %v127_v5  ;;  %229 = vmatpush.msra.mxu0 %v110_v4  ;;  %v140_v11 = vld [vmem:[#allocation5 + $0x160] sm:$0xff]  ;;  %v125_v13 = vld [vmem:[#allocation5 + $0xe8] sm:$0xff]  ;;  %v139_v16 = vld [vmem:[#allocation5 + $0x158] sm:$0xff] }
  0x18   :  { %289 = vmatpush.msra.mxu3 %v158_v7  ;;  %v108_v12 = vld [vmem:[#allocation5 + $0x60] sm:$0xff]  ;;  %270 = vmatpush.msra.mxu2 %v141_v6  ;;  %v107_v17 = vld [vmem:[#allocation5 + $0x58] sm:$0xff]  ;;  %v138_v20 = vld [vmem:[#allocation5 + $0x150] sm:$0xff] }
  0x19   :  { %249 = vmatpush.msra.mxu1 %v126_v9  ;;  %230 = vmatpush.msra.mxu0 %v109_v8  ;;  %v156_v14 = vld [vmem:[#allocation5 + $0x1e0] sm:$0xff]  ;;  %v155_v18 = vld [vmem:[#allocation5 + $0x1d8] sm:$0xff]  ;;  %v106_v21 = vld [vmem:[#allocation5 + $0x50] sm:$0xff] }
  0x1a   :  { %v124_v15 = vld [vmem:[#allocation5 + $0xe0] sm:$0xff]  ;;  %290 = vmatpush.msra.mxu3 %v157_v10  ;;  %271 = vmatpush.msra.mxu2 %v140_v11  ;;  %v123_v19 = vld [vmem:[#allocation5 + $0xd8] sm:$0xff]  ;;  %v154_v22 = vld [vmem:[#allocation5 + $0x1d0] sm:$0xff] }
  0x1b   :  { %250 = vmatpush.msra.mxu1 %v125_v13  ;;  %231 = vmatpush.msra.mxu0 %v108_v12  ;;  %v122_v23 = vld [vmem:[#allocation5 + $0xd0] sm:$0xff]  ;;  %v137_v24 = vld [vmem:[#allocation5 + $0x148] sm:$0xff]  ;;  %v136_v28 = vld [vmem:[#allocation5 + $0x140] sm:$0xff] }
  0x1c   :  { %291 = vmatpush.msra.mxu3 %v156_v14  ;;  %272 = vmatpush.msra.mxu2 %v139_v16  ;;  %v105_v25 = vld [vmem:[#allocation5 + $0x48] sm:$0xff]  ;;  %v104_v29 = vld [vmem:[#allocation5 + $0x40] sm:$0xff]  ;;  %v135_v32 = vld [vmem:[#allocation5 + $0x138] sm:$0xff] }
  0x1d   :  { %251 = vmatpush.msra.mxu1 %v124_v15  ;;  %232 = vmatpush.msra.mxu0 %v107_v17  ;;  %v153_v26 = vld [vmem:[#allocation5 + $0x1c8] sm:$0xff]  ;;  %v152_v30 = vld [vmem:[#allocation5 + $0x1c0] sm:$0xff]  ;;  %v103_v33 = vld [vmem:[#allocation5 + $0x38] sm:$0xff] }
  0x1e   :  { %292 = vmatpush.msra.mxu3 %v155_v18  ;;  %273 = vmatpush.msra.mxu2 %v138_v20  ;;  %v121_v27 = vld [vmem:[#allocation5 + $0xc8] sm:$0xff]  ;;  %v120_v31 = vld [vmem:[#allocation5 + $0xc0] sm:$0xff]  ;;  %v151_v34 = vld [vmem:[#allocation5 + $0x1b8] sm:$0xff] }
  0x1f   :  { %252 = vmatpush.msra.mxu1 %v123_v19  ;;  %233 = vmatpush.msra.mxu0 %v106_v21  ;;  %v119_v35 = vld [vmem:[#allocation5 + $0xb8] sm:$0xff]  ;;  %v134_v36 = vld [vmem:[#allocation5 + $0x130] sm:$0xff]  ;;  %v133_v40 = vld [vmem:[#allocation5 + $0x128] sm:$0xff] }
  0x20   :  { %293 = vmatpush.msra.mxu3 %v154_v22  ;;  %274 = vmatpush.msra.mxu2 %v137_v24  ;;  %v102_v37 = vld [vmem:[#allocation5 + $0x30] sm:$0xff]  ;;  %v101_v41 = vld [vmem:[#allocation5 + $0x28] sm:$0xff]  ;;  %v132_v44 = vld [vmem:[#allocation5 + $0x120] sm:$0xff] }
  0x21   :  { %253 = vmatpush.msra.mxu1 %v122_v23  ;;  %234 = vmatpush.msra.mxu0 %v105_v25  ;;  %v150_v38 = vld [vmem:[#allocation5 + $0x1b0] sm:$0xff]  ;;  %v149_v42 = vld [vmem:[#allocation5 + $0x1a8] sm:$0xff]  ;;  %v100_v45 = vld [vmem:[#allocation5 + $0x20] sm:$0xff] }
  0x22   :  { %294 = vmatpush.msra.mxu3 %v153_v26  ;;  %275 = vmatpush.msra.mxu2 %v136_v28  ;;  %v118_v39 = vld [vmem:[#allocation5 + $0xb0] sm:$0xff]  ;;  %v117_v43 = vld [vmem:[#allocation5 + $0xa8] sm:$0xff]  ;;  %v148_v46 = vld [vmem:[#allocation5 + $0x1a0] sm:$0xff] }
  0x23   :  { %254 = vmatpush.msra.mxu1 %v121_v27  ;;  %235 = vmatpush.msra.mxu0 %v104_v29  ;;  %v116_v47 = vld [vmem:[#allocation5 + $0xa0] sm:$0xff]  ;;  %v131_v48 = vld [vmem:[#allocation5 + $0x118] sm:$0xff]  ;;  %v130_v52 = vld [vmem:[#allocation5 + $0x110] sm:$0xff] }
  0x24   :  { %295 = vmatpush.msra.mxu3 %v152_v30  ;;  %276 = vmatpush.msra.mxu2 %v135_v32  ;;  %v99_v49 = vld [vmem:[#allocation5 + $0x18] sm:$0xff]  ;;  %v98_v53 = vld [vmem:[#allocation5 + $0x10] sm:$0xff]  ;;  %v129_v56 = vld [vmem:[#allocation5 + $0x108] sm:$0xff] }
  0x25   :  { %255 = vmatpush.msra.mxu1 %v120_v31  ;;  %236 = vmatpush.msra.mxu0 %v103_v33  ;;  %v147_v50 = vld [vmem:[#allocation5 + $0x198] sm:$0xff]  ;;  %v146_v54 = vld [vmem:[#allocation5 + $0x190] sm:$0xff]  ;;  %v97_v57 = vld [vmem:[#allocation5 + $0x8] sm:$0xff] }
  0x26   :  { %296 = vmatpush.msra.mxu3 %v151_v34  ;;  %277 = vmatpush.msra.mxu2 %v134_v36  ;;  %v115_v51 = vld [vmem:[#allocation5 + $0x98] sm:$0xff]  ;;  %v114_v55 = vld [vmem:[#allocation5 + $0x90] sm:$0xff]  ;;  %v145_v58 = vld [vmem:[#allocation5 + $0x188] sm:$0xff] }
  0x27   :  { %256 = vmatpush.msra.mxu1 %v119_v35  ;;  %237 = vmatpush.msra.mxu0 %v102_v37  ;;  %v113_v59 = vld [vmem:[#allocation5 + $0x88] sm:$0xff]  ;;  %v128_v60 = vld [vmem:[#allocation5 + $0x100] sm:$0xff]  ;;  %v207_v62 = vld [vmem:[#allocation5 + $0x378] sm:$0xff] }
  0x28   :  { %297 = vmatpush.msra.mxu3 %v150_v38  ;;  %278 = vmatpush.msra.mxu2 %v133_v40  ;;  %v96_v61 = vld [vmem:[#allocation5] sm:$0xff]  ;;  %v175_v0 = vld [vmem:[#allocation5 + $0x278] sm:$0xff]  ;;  %v206_v2 = vld [vmem:[#allocation5 + $0x370] sm:$0xff] }
  0x29   :  { %257 = vmatpush.msra.mxu1 %v118_v39  ;;  %238 = vmatpush.msra.mxu0 %v101_v41  ;;  %v144_v63 = vld [vmem:[#allocation5 + $0x180] sm:$0xff]  ;;  %v223_v1 = vld [vmem:[#allocation5 + $0x3f8] sm:$0xff]  ;;  %v174_v4 = vld [vmem:[#allocation5 + $0x270] sm:$0xff] }
  0x2a   :  { %298 = vmatpush.msra.mxu3 %v149_v42  ;;  %279 = vmatpush.msra.mxu2 %v132_v44  ;;  %v112_v3 = vld [vmem:[#allocation5 + $0x80] sm:$0xff]  ;;  %v191_v5 = vld [vmem:[#allocation5 + $0x2f8] sm:$0xff]  ;;  %v205_v6 = vld [vmem:[#allocation5 + $0x368] sm:$0xff] }
  0x2b   :  { %258 = vmatpush.msra.mxu1 %v117_v43  ;;  %239 = vmatpush.msra.mxu0 %v100_v45  ;;  %v222_v7 = vld [vmem:[#allocation5 + $0x3f0] sm:$0xff]  ;;  %v173_v8 = vld [vmem:[#allocation5 + $0x268] sm:$0xff]  ;;  %v204_v10 = vld [vmem:[#allocation5 + $0x360] sm:$0xff] }
  0x2c   :  { %299 = vmatpush.msra.mxu3 %v148_v46  ;;  %280 = vmatpush.msra.mxu2 %v131_v48  ;;  %v190_v9 = vld [vmem:[#allocation5 + $0x2f0] sm:$0xff]  ;;  %v221_v11 = vld [vmem:[#allocation5 + $0x3e8] sm:$0xff]  ;;  %v172_v12 = vld [vmem:[#allocation5 + $0x260] sm:$0xff] }
  0x2d   :  { %259 = vmatpush.msra.mxu1 %v116_v47  ;;  %240 = vmatpush.msra.mxu0 %v99_v49  ;;  %v189_v13 = vld [vmem:[#allocation5 + $0x2e8] sm:$0xff]  ;;  %v203_v14 = vld [vmem:[#allocation5 + $0x358] sm:$0xff]  ;;  %v220_v15 = vld [vmem:[#allocation5 + $0x3e0] sm:$0xff] }
  0x2e   :  { %300 = vmatpush.msra.mxu3 %v147_v50  ;;  %281 = vmatpush.msra.mxu2 %v130_v52  ;;  %v171_v16 = vld [vmem:[#allocation5 + $0x258] sm:$0xff]  ;;  %v188_v17 = vld [vmem:[#allocation5 + $0x2e0] sm:$0xff]  ;;  %v202_v18 = vld [vmem:[#allocation5 + $0x350] sm:$0xff] }
  0x2f   :  { %260 = vmatpush.msra.mxu1 %v115_v51  ;;  %241 = vmatpush.msra.mxu0 %v98_v53  ;;  %v219_v19 = vld [vmem:[#allocation5 + $0x3d8] sm:$0xff]  ;;  %v170_v20 = vld [vmem:[#allocation5 + $0x250] sm:$0xff]  ;;  %v201_v22 = vld [vmem:[#allocation5 + $0x348] sm:$0xff] }
  0x30   :  { %301 = vmatpush.msra.mxu3 %v146_v54  ;;  %282 = vmatpush.msra.mxu2 %v129_v56  ;;  %v187_v21 = vld [vmem:[#allocation5 + $0x2d8] sm:$0xff]  ;;  %v218_v23 = vld [vmem:[#allocation5 + $0x3d0] sm:$0xff]  ;;  %v169_v24 = vld [vmem:[#allocation5 + $0x248] sm:$0xff] }
  0x31   :  { %261 = vmatpush.msra.mxu1 %v114_v55  ;;  %242 = vmatpush.msra.mxu0 %v97_v57  ;;  %v186_v25 = vld [vmem:[#allocation5 + $0x2d0] sm:$0xff]  ;;  %v200_v26 = vld [vmem:[#allocation5 + $0x340] sm:$0xff]  ;;  %v217_v27 = vld [vmem:[#allocation5 + $0x3c8] sm:$0xff] }
  0x32   :  { %302 = vmatpush.msra.mxu3 %v145_v58  ;;  %283 = vmatpush.msra.mxu2 %v128_v60  ;;  %v168_v28 = vld [vmem:[#allocation5 + $0x240] sm:$0xff]  ;;  %v185_v29 = vld [vmem:[#allocation5 + $0x2c8] sm:$0xff]  ;;  %v199_v30 = vld [vmem:[#allocation5 + $0x338] sm:$0xff] }
  0x33   :  { %262 = vmatpush.msra.mxu1 %v113_v59  ;;  %243 = vmatpush.msra.mxu0 %v96_v61  ;;  %v216_v31 = vld [vmem:[#allocation5 + $0x3c0] sm:$0xff]  ;;  %v167_v32 = vld [vmem:[#allocation5 + $0x238] sm:$0xff]  ;;  %v198_v34 = vld [vmem:[#allocation5 + $0x330] sm:$0xff] }
  0x34   :  { %348 = vmatpush.msrb.mxu2 %v207_v62  ;;  %303 = vmatpush.msra.mxu3 %v144_v63  ;;  %v184_v33 = vld [vmem:[#allocation5 + $0x2c0] sm:$0xff]  ;;  %v215_v35 = vld [vmem:[#allocation5 + $0x3b8] sm:$0xff]  ;;  %v166_v36 = vld [vmem:[#allocation5 + $0x230] sm:$0xff] }
  0x35   :  { %308 = vmatpush.msrb.mxu0 %v175_v0  ;;  %263 = vmatpush.msra.mxu1 %v112_v3  ;;  %v183_v37 = vld [vmem:[#allocation5 + $0x2b8] sm:$0xff]  ;;  %v197_v38 = vld [vmem:[#allocation5 + $0x328] sm:$0xff]  ;;  %v214_v39 = vld [vmem:[#allocation5 + $0x3b0] sm:$0xff] }
  0x36   :  { %368 = vmatpush.msrb.mxu3 %v223_v1  ;;  %349 = vmatpush.msrb.mxu2 %v206_v2  ;;  %v165_v40 = vld [vmem:[#allocation5 + $0x228] sm:$0xff]  ;;  %v182_v41 = vld [vmem:[#allocation5 + $0x2b0] sm:$0xff]  ;;  %v196_v42 = vld [vmem:[#allocation5 + $0x320] sm:$0xff] }
  0x37   :  { %309 = vmatpush.msrb.mxu0 %v174_v4  ;;  %328 = vmatpush.msrb.mxu1 %v191_v5  ;;  %v213_v43 = vld [vmem:[#allocation5 + $0x3a8] sm:$0xff]  ;;  %v90_v44 = vld [vmem:[#allocation2 + $0x10] sm:$0xff]  ;;  %v164_v45 = vld [vmem:[#allocation5 + $0x220] sm:$0xff] }
  0x38   :  { %350 = vmatpush.msrb.mxu2 %v205_v6  ;;  %369 = vmatpush.msrb.mxu3 %v222_v7  ;;  %v181_v46 = vld [vmem:[#allocation5 + $0x2a8] sm:$0xff]  ;;  %v195_v47 = vld [vmem:[#allocation5 + $0x318] sm:$0xff]  ;;  %v212_v48 = vld [vmem:[#allocation5 + $0x3a0] sm:$0xff] }
  0x39   :  { %310 = vmatpush.msrb.mxu0 %v173_v8  ;;  %329 = vmatpush.msrb.mxu1 %v190_v9  ;;  %v88_v49 = vld [vmem:[#allocation2] sm:$0xff]  ;;  %v91_v50 = vld [vmem:[#allocation2 + $0x18] sm:$0xff]  ;;  %v194_v53 = vld [vmem:[#allocation5 + $0x310] sm:$0xff] }
  0x3a   :  { %351 = vmatpush.msrb.mxu2 %v204_v10  ;;  %370 = vmatpush.msrb.mxu3 %v221_v11  ;;  %v163_v51 = vld [vmem:[#allocation5 + $0x218] sm:$0xff]  ;;  %v180_v52 = vld [vmem:[#allocation5 + $0x2a0] sm:$0xff]  ;;  %v89_v55 = vld [vmem:[#allocation2 + $0x8] sm:$0xff] }
  0x3b   :  { %311 = vmatpush.msrb.mxu0 %v172_v12  ;;  %330 = vmatpush.msrb.mxu1 %v189_v13  ;;  %v211_v54 = vld [vmem:[#allocation5 + $0x398] sm:$0xff]  ;;  %v162_v56 = vld [vmem:[#allocation5 + $0x210] sm:$0xff]  ;;  %v193_v58 = vld [vmem:[#allocation5 + $0x308] sm:$0xff] }
  0x3c   :  { %352 = vmatpush.msrb.mxu2 %v203_v14  ;;  %371 = vmatpush.msrb.mxu3 %v220_v15  ;;  %v179_v57 = vld [vmem:[#allocation5 + $0x298] sm:$0xff]  ;;  %v210_v59 = vld [vmem:[#allocation5 + $0x390] sm:$0xff]  ;;  %v161_v60 = vld [vmem:[#allocation5 + $0x208] sm:$0xff] }
  0x3d   :  { %312 = vmatpush.msrb.mxu0 %v171_v16  ;;  %331 = vmatpush.msrb.mxu1 %v188_v17  ;;  %v178_v61 = vld [vmem:[#allocation5 + $0x290] sm:$0xff]  ;;  %v192_v62 = vld [vmem:[#allocation5 + $0x300] sm:$0xff]  ;;  %v209_v63 = vld [vmem:[#allocation5 + $0x388] sm:$0xff] }
  0x3e   :  { %353 = vmatpush.msrb.mxu2 %v202_v18  ;;  %372 = vmatpush.msrb.mxu3 %v219_v19  ;;  %v94_v0 = vld [vmem:[#allocation2 + $0x30] sm:$0xff]  ;;  %v160_v1 = vld [vmem:[#allocation5 + $0x200] sm:$0xff]  ;;  %v177_v2 = vld [vmem:[#allocation5 + $0x288] sm:$0xff] }
  0x3f   :  { %313 = vmatpush.msrb.mxu0 %v170_v20  ;;  %332 = vmatpush.msrb.mxu1 %v187_v21  ;;  %v208_v3 = vld [vmem:[#allocation5 + $0x380] sm:$0xff]  ;;  %v95_v5 = vld [vmem:[#allocation2 + $0x38] sm:$0xff]  ;;  %v93_v8 = vld [vmem:[#allocation2 + $0x28] sm:$0xff] }
  0x40   :  { %354 = vmatpush.msrb.mxu2 %v201_v22  ;;  %373 = vmatpush.msrb.mxu3 %v218_v23  ;;  %v92_v4 = vld [vmem:[#allocation2 + $0x20] sm:$0xff]  ;;  %v404_v7 = vld [vmem:[#allocation7 + $0x78] sm:$0xff]  ;;  %v403_v9 = vld [vmem:[#allocation7 + $0x70] sm:$0xff] }
  0x41   :  { %314 = vmatpush.msrb.mxu0 %v169_v24  ;;  %333 = vmatpush.msrb.mxu1 %v186_v25  ;;  %v176_v6 = vld [vmem:[#allocation5 + $0x280] sm:$0xff]  ;;  %v402_v10 = vld [vmem:[#allocation7 + $0x68] sm:$0xff]  ;;  %v400_v12 = vld [vmem:[#allocation7 + $0x58] sm:$0xff] }
  0x42   :  { %355 = vmatpush.msrb.mxu2 %v200_v26  ;;  %374 = vmatpush.msrb.mxu3 %v217_v27  ;;  %v401_v11 = vld [vmem:[#allocation7 + $0x60] sm:$0xff]  ;;  %v399_v13 = vld [vmem:[#allocation7 + $0x50] sm:$0xff]  ;;  %v398_v14 = vld [vmem:[#allocation7 + $0x48] sm:$0xff] }
  0x43   :  { %315 = vmatpush.msrb.mxu0 %v168_v28  ;;  %334 = vmatpush.msrb.mxu1 %v185_v29  ;;  %v397_v15 = vld [vmem:[#allocation7 + $0x40] sm:$0xff]  ;;  %v396_v16 = vld [vmem:[#allocation7 + $0x38] sm:$0xff]  ;;  %v395_v17 = vld [vmem:[#allocation7 + $0x30] sm:$0xff] }
  0x44   :  { %356 = vmatpush.msrb.mxu2 %v199_v30  ;;  %375 = vmatpush.msrb.mxu3 %v216_v31  ;;  %v394_v18 = vld [vmem:[#allocation7 + $0x28] sm:$0xff]  ;;  %v393_v19 = vld [vmem:[#allocation7 + $0x20] sm:$0xff]  ;;  %v392_v20 = vld [vmem:[#allocation7 + $0x18] sm:$0xff] }
  0x45   :  { %316 = vmatpush.msrb.mxu0 %v167_v32  ;;  %335 = vmatpush.msrb.mxu1 %v184_v33  ;;  %v391_v21 = vld [vmem:[#allocation7 + $0x10] sm:$0xff]  ;;  %v390_v22 = vld [vmem:[#allocation7 + $0x8] sm:$0xff]  ;;  %v389_v23 = vld [vmem:[#allocation7] sm:$0xff] }
  0x46   :  { %357 = vmatpush.msrb.mxu2 %v198_v34  ;;  %376 = vmatpush.msrb.mxu3 %v215_v35  ;;  %v445_v24 = vld [vmem:[#allocation8 + $0x78] sm:$0xff]  ;;  %v444_v25 = vld [vmem:[#allocation8 + $0x70] sm:$0xff]  ;;  %v443_v26 = vld [vmem:[#allocation8 + $0x68] sm:$0xff] }
  0x47   :  { %317 = vmatpush.msrb.mxu0 %v166_v36  ;;  %336 = vmatpush.msrb.mxu1 %v183_v37  ;;  %v442_v27 = vld [vmem:[#allocation8 + $0x60] sm:$0xff]  ;;  %v441_v28 = vld [vmem:[#allocation8 + $0x58] sm:$0xff]  ;;  %v440_v30 = vld [vmem:[#allocation8 + $0x50] sm:$0xff] }
  0x48   :  { %358 = vmatpush.msrb.mxu2 %v197_v38  ;;  %377 = vmatpush.msrb.mxu3 %v214_v39  ;;  %v516_v29 = vld [vmem:[%s724_s2] ss:$0 sm:$0xff]  ;;  %v439_v31 = vld [vmem:[#allocation8 + $0x48] sm:$0xff]  ;;  %v437_v36 = vld [vmem:[#allocation8 + $0x38] sm:$0xff] }
  0x49   :  { %318 = vmatpush.msrb.mxu0 %v165_v40  ;;  %337 = vmatpush.msrb.mxu1 %v182_v41  ;;  %v438_v34 = vld [vmem:[#allocation8 + $0x40] sm:$0xff]  ;;  %v436_v39 = vld [vmem:[#allocation8 + $0x30] sm:$0xff] }
  0x4a   :  { %359 = vmatpush.msrb.mxu2 %v196_v42  ;;  %378 = vmatpush.msrb.mxu3 %v213_v43  ;;  %v435_v42 = vld [vmem:[#allocation8 + $0x28] sm:$0xff] }
  0x4b   :  { %284 = vmatmul.f32.vlgmr.msra.gmra.mxu2 %v90_v44  ;;  %319 = vmatpush.msrb.mxu0 %v164_v45  ;;  %v434_v44 = vld [vmem:[#allocation8 + $0x20] sm:$0xff] }
  0x4c   :  { %338 = vmatpush.msrb.mxu1 %v181_v46  ;;  %360 = vmatpush.msrb.mxu2 %v195_v47  ;;  %v433_v47 = vld [vmem:[#allocation8 + $0x18] sm:$0xff] }
  0x4d   :  { %379 = vmatpush.msrb.mxu3 %v212_v48  ;;  %244 = vmatmul.f32.vlgmr.msra.gmra.mxu0 %v88_v49 }
  0x4e   :  { %304 = vmatmul.f32.vlgmr.msra.gmra.mxu3 %v91_v50  ;;  %320 = vmatpush.msrb.mxu0 %v163_v51 }
  0x4f   :  { %339 = vmatpush.msrb.mxu1 %v180_v52  ;;  %361 = vmatpush.msrb.mxu2 %v194_v53 }
  0x50   :  { %380 = vmatpush.msrb.mxu3 %v211_v54  ;;  %264 = vmatmul.f32.vlgmr.msra.gmra.mxu1 %v89_v55  ;;  %v432_v55 = vld [vmem:[#allocation8 + $0x10] sm:$0xff] }
  0x51   :  { %321 = vmatpush.msrb.mxu0 %v162_v56  ;;  %340 = vmatpush.msrb.mxu1 %v179_v57  ;;  %v431_v56 = vld [vmem:[#allocation8 + $0x8] sm:$0xff]  ;;  %v430_v57 = vld [vmem:[#allocation8] sm:$0xff] }
  0x52   :  { %362 = vmatpush.msrb.mxu2 %v193_v58  ;;  %381 = vmatpush.msrb.mxu3 %v210_v59  ;;  %v517_v58 = vld [vmem:[%s726_s4] ss:$0 sm:$0xff]  ;;  %s657_s4 = smov [#allocation10]  }
  0x53   :  { %322 = vmatpush.msrb.mxu0 %v161_v60  ;;  %341 = vmatpush.msrb.mxu1 %v178_v61 }
  0x54   :  { %363 = vmatpush.msrb.mxu2 %v192_v62  ;;  %382 = vmatpush.msrb.mxu3 %v209_v63  ;;  %v518_v62 = vld [vmem:[%s728_s6] ss:$0 sm:$0xff]  ;;  %s495_s6 = sshll.u32 %s657_s4, 4  ;;  %s496_s6 = int_to_ptr.vmem [resolvable:$true] %s495_s6 }
  0x55   :  { %364 = vmatmul.f32.vlgmr.msrb.gmra.mxu2 %v94_v0  ;;  %323 = vmatpush.msrb.mxu0 %v160_v1 }
  0x56   :  { %342 = vmatpush.msrb.mxu1 %v177_v2  ;;  %383 = vmatpush.msrb.mxu3 %v208_v3 }
  0x57   :  { %324 = vmatmul.f32.vlgmr.msrb.gmra.mxu0 %v92_v4  ;;  %384 = vmatmul.f32.vlgmr.msrb.gmra.mxu3 %v95_v5 }
  0x58   :  { %343 = vmatpush.msrb.mxu1 %v176_v6  ;;  %409 = vmatpush.msra.mxu0 %v404_v7  ;;  %v470_v7 = vlaneseq }
  0x59   :  { %344 = vmatmul.f32.vlgmr.msrb.gmra.mxu1 %v93_v8 }
  0x5a   :  { %410 = vmatpush.msra.mxu0 %v403_v9  ;;  %450 = vmatpush.msra.mxu1 %v445_v24 }
  0x5c   :  { %411 = vmatpush.msra.mxu0 %v402_v10  ;;  %451 = vmatpush.msra.mxu1 %v444_v25  ;;  %v471_v10 = vand.u32 127, %v470_v7 }
  0x5e   :  { %412 = vmatpush.msra.mxu0 %v401_v11  ;;  %452 = vmatpush.msra.mxu1 %v443_v26  ;;  %vm472_vm1 = vcmp.lt.s32.totalorder %v471_v10, 8 }
  0x60   :  { %413 = vmatpush.msra.mxu0 %v400_v12  ;;  %453 = vmatpush.msra.mxu1 %v442_v27 }
  0x62   :  { %414 = vmatpush.msra.mxu0 %v399_v13  ;;  %454 = vmatpush.msra.mxu1 %v441_v28 }
  0x64   :  { %415 = vmatpush.msra.mxu0 %v398_v14  ;;  %455 = vmatpush.msra.mxu1 %v440_v30 }
  0x66   :  { %416 = vmatpush.msra.mxu0 %v397_v15  ;;  %456 = vmatpush.msra.mxu1 %v439_v31 }
  0x68   :  { %417 = vmatpush.msra.mxu0 %v396_v16  ;;  %457 = vmatpush.msra.mxu1 %v438_v34 }
  0x6a   :  { %418 = vmatpush.msra.mxu0 %v395_v17  ;;  %458 = vmatpush.msra.mxu1 %v437_v36 }
  0x6c   :  { %419 = vmatpush.msra.mxu0 %v394_v18  ;;  %459 = vmatpush.msra.mxu1 %v436_v39 }
  0x6e   :  { %420 = vmatpush.msra.mxu0 %v393_v19  ;;  %460 = vmatpush.msra.mxu1 %v435_v42 }
  0x70   :  { %421 = vmatpush.msra.mxu0 %v392_v20  ;;  %461 = vmatpush.msra.mxu1 %v434_v44 }
  0x72   :  { %422 = vmatpush.msra.mxu0 %v391_v21  ;;  %462 = vmatpush.msra.mxu1 %v433_v47 }
  0x74   :  { %423 = vmatpush.msra.mxu0 %v390_v22  ;;  %463 = vmatpush.msra.mxu1 %v432_v55 }
  0x76   :  { %424 = vmatpush.msra.mxu0 %v389_v23  ;;  %464 = vmatpush.msra.mxu1 %v431_v56 }
  0x78   :  { %465 = vmatpush.msra.mxu1 %v430_v57 }
  0xca   :  { %v245_v32 = vpop.f32.mrf.mxu0 }
  0xcb   :  { %v246_v33 = vadd.f32 %v516_v29, %v245_v32 }
  0xcd   :  { %v265_v35 = vpop.f32.mrf.mxu1 }
  0xce   :  { %v266_v37 = vadd.f32 %v265_v35, %v246_v33  ;;  %v285_v38 = vpop.f32.mrf.mxu2 }
  0xd0   :  { %v286_v40 = vadd.f32 %v285_v38, %v266_v37 }
  0xd1   :  { %v305_v41 = vpop.f32.mrf.mxu3 }
  0xd2   :  { %v306_v43 = vadd.f32 %v305_v41, %v286_v40 }
  0xd4   :  { %v325_v45 = vpop.f32.mrf.mxu0 }
  0xd5   :  { %v326_v46 = vadd.f32 %v325_v45, %v306_v43 }
  0xd6   :  { %v345_v48 = vpop.f32.mrf.mxu1 }
  0xd7   :  { %v346_v49 = vadd.f32 %v345_v48, %v326_v46 }
  0xd8   :  { %v365_v50 = vpop.f32.mrf.mxu2 }
  0xd9   :  { %v366_v51 = vadd.f32 %v365_v50, %v346_v49 }
  0xda   :  { %v385_v52 = vpop.f32.mrf.mxu3 }
  0xdb   :  { %v386_v53 = vadd.f32 %v385_v52, %v366_v51 }
  0xdd   :  { %v388_v54 = vmax.f32 %v386_v53, 0.0 }
  0xdf   :  { %425 = vmatmul.f32.vlgmr.msra.gmra.mxu0 %v388_v54 }
 0x15c   :  { %v426_v59 = vpop.f32.mrf.mxu0 }
 0x15d   :  { %v427_v60 = vadd.f32 %v517_v58, %v426_v59 }
 0x15f   :  { %v429_v61 = vmax.f32 %v427_v60, 0.0 }
 0x161   :  { %466 = vmatmul.f32.vlgmr.msra.gmra.mxu1 %v429_v61 }
 0x1de   :  { %v467_v63 = vpop.f32.mrf.mxu1 }
 0x1df   :  { %v468_v0 = vadd.f32 %v518_v62, %v467_v63 }
 0x1e1   :  { %v474_v1 = vand.u32 2147483647, %v468_v0  ;;  %v473_v14 = vmax.f32 %v468_v0, 0.0 }
 0x1e3   :  { %v475_v2 = vsub.f32 0.0, %v474_v1 }
 0x1e5   :  { %v476_v3 = vmul.f32 1.442695, %v475_v2 }
 0x1e7   :  { %519 = vpow2.f32 %v476_v3 }
 0x1ed   :  { %v520_v4 = vpop.eup %519 }
 0x1ee   :  { %v478_v5 = vadd.f32 1.0, %v520_v4  ;;  %v481_v6 = vmul.f32 -0.5, %v520_v4  ;;  %v484_v9 = vand.u32 2147483647, %v520_v4 }
 0x1f0   :  { %521 = vlog2.f32 %v478_v5  ;;  %v482_v8 = vadd.f32 1.0, %v481_v6  ;;  %vm485_vm0 = vcmp.lt.f32.partialorder %v484_v9, 0.0004427343 }
 0x1f2   :  { %v483_v13 = vmul.f32 %v520_v4, %v482_v8 }
 0x1f6   :  { %v522_v11 = vpop.eup %521 }
 0x1f7   :  { %v480_v12 = vmul.f32 0.6931472, %v522_v11 }
 0x1f9   :  { %v486_v15 = vsel %vm485_vm0, %v483_v13, %v480_v12 }
 0x1fa   :  { %v487_v16 = vadd.f32 %v486_v15, %v473_v14 }
 0x1fc   :  { %v488_v17 = vsel %vm472_vm1, %v468_v0, %v487_v16 }
 0x1fd   :  { %489 = vst [vmem:[#allocation10] sm:$0xff] %v488_v17 }
 0x1fe   :  { %500 = dma.vmem_to_hbm [thread:$0]  %s496_s6, 128, %s498_s26, [#allocation4]  }
 0x1ff   :  { %649 = dma.done.wait [#allocation4], 128  }
 0x200   :  { %650 = vsyncadd [#allocation4], 4294967168 }
 0x201   :  { %505 = vsyncpa [#allocation3], 1 }
 0x202   :  { %506 = vsyncpa [#allocation6], 1 }
 0x203   :  { %507 = vsyncpa [#allocation9], 1 }
 0x204   :  { %508 = vsyncpa [#allocation4], 1 }

// kernel: tpu_custom_call.1
= control target key start
LH: loop header
LB: loop body
LE: loop exit
PB: predicated region body
PF: predicated region fallthrough
CT: control target
= control target key end

     0   :  { %12 = vsyncpa [#allocation3], 0  ;;  %s722_s0 = inlined_call_operand.hbm [shape: f32[8,1024], index: 0, kind: input, shape index: {}]   ;;  %s723_s1 = inlined_call_operand.hbm [shape: f32[1024,128], index: 1, kind: input, shape index: {}]   ;;  %s724_s2 = inlined_call_operand.vmem [shape: f32[1,128], index: 2, kind: input, shape index: {}]   ;;  %s725_s3 = inlined_call_operand.hbm [shape: f32[128,128], index: 3, kind: input, shape index: {}]   ;;  %s726_s4 = inlined_call_operand.vmem [shape: f32[1,128], index: 4, kind: input, shape index: {}]   ;;  %s727_s5 = inlined_call_operand.hbm [shape: f32[128,128], index: 5, kind: input, shape index: {}]   ;;  %s728_s6 = inlined_call_operand.vmem [shape: f32[1,128], index: 6, kind: input, shape index: {}]   ;;  %s729_s7 = inlined_call_operand.hbm [shape: f32[8,128], index: 7, kind: output, shape index: {}]  }
   0x1   :  { %13 = vsyncpa [#allocation6], 0 }
   0x2   :  { %14 = vsyncpa [#allocation9], 0  ;;  %s31_s26 = sshll.u32 %s723_s1, 4  ;;  %s32_s26 = int_to_ptr.hbm [resolvable:$true] %s31_s26 }
   0x3   :  { %15 = vsyncpa [#allocation4], 0  ;;  %s651_s27 = smov [#allocation5]   ;;  %s21_s8 = sshll.u32 %s722_s0, 4  ;;  %s22_s8 = int_to_ptr.hbm [resolvable:$true] %s21_s8 }
   0x4   :  { %s33_s28 = sshll.u32 %s651_s27, 4  ;;  %s652_s9 = smov 128   ;;  %s34_s28 = int_to_ptr.vmem [resolvable:$true] %s33_s28 }
   0x5   :  { %s653_s10 = smov 8   ;;  %s654_s11 = smov [#allocation2]  }
   0x6   :  { %39 = dma.hbm_to_vmem [thread:$0]  %s32_s26, 16384, %s34_s28, [#allocation6], %s652_s9, %s652_s9, %s653_s10  }
   0x7   :  { %s23_s12 = sshll.u32 %s654_s11, 4  ;;  %s46_s15 = sshll.u32 %s725_s3, 4  ;;  %s24_s12 = int_to_ptr.vmem [resolvable:$true] %s23_s12  ;;  %s47_s15 = int_to_ptr.hbm [resolvable:$true] %s46_s15 }
   0x8   :  { %26 = dma.hbm_to_vmem [thread:$0]  %s22_s8, 1024, %s24_s12, [#allocation3]  }
   0x9   :  { %s61_s17 = sshll.u32 %s727_s5, 4  ;;  %s655_s18 = smov [#allocation7]   ;;  %s62_s17 = int_to_ptr.hbm [resolvable:$true] %s61_s17 }
   0xa   :  { %s48_s19 = sshll.u32 %s655_s18, 4  ;;  %s656_s0 = smov [#allocation8]   ;;  %s49_s19 = int_to_ptr.vmem [resolvable:$true] %s48_s19 }
   0xb   :  { %54 = dma.hbm_to_vmem [thread:$0]  %s47_s15, 2048, %s49_s19, [#allocation6], %s652_s9, %s652_s9, %s653_s10  }
   0xc   :  { %s63_s20 = sshll.u32 %s656_s0, 4  ;;  %s64_s20 = int_to_ptr.vmem [resolvable:$true] %s63_s20 }
   0xd   :  { %69 = dma.hbm_to_vmem [thread:$0]  %s62_s17, 2048, %s64_s20, [#allocation9], %s652_s9, %s652_s9, %s653_s10  }
   0xe   :  { %643 = dma.done.wait [#allocation3], 1024  }
   0xf   :  { %644 = vsyncadd [#allocation3], 4294966272 }
  0x10   :  { %645 = dma.done.wait [#allocation6], 18432  }
  0x11   :  { %646 = vsyncadd [#allocation6], 4294948864 }
  0x12   :  { %647 = dma.done.wait [#allocation9], 2048  }
  0x13   :  { %648 = vsyncadd [#allocation9], 4294965248  ;;  %v143_v0 = vld [vmem:[#allocation5 + $0x178] sm:$0xff]  ;;  %v142_v2 = vld [vmem:[#allocation5 + $0x170] sm:$0xff]  ;;  %s497_s26 = sshll.u32 %s729_s7, 4  ;;  %s498_s26 = int_to_ptr.hbm [resolvable:$true] %s497_s26 }
  0x14   :  { %v111_v1 = vld [vmem:[#allocation5 + $0x78] sm:$0xff]  ;;  %268 = vmatpush.msra.mxu2 %v143_v0  ;;  %v110_v4 = vld [vmem:[#allocation5 + $0x70] sm:$0xff]  ;;  %v141_v6 = vld [vmem:[#allocation5 + $0x168] sm:$0xff] }
  0x15   :  { %228 = vmatpush.msra.mxu0 %v111_v1  ;;  %v159_v3 = vld [vmem:[#allocation5 + $0x1f8] sm:$0xff]  ;;  %v158_v7 = vld [vmem:[#allocation5 + $0x1f0] sm:$0xff]  ;;  %v109_v8 = vld [vmem:[#allocation5 + $0x68] sm:$0xff] }
  0x16   :  { %v127_v5 = vld [vmem:[#allocation5 + $0xf8] sm:$0xff]  ;;  %288 = vmatpush.msra.mxu3 %v159_v3  ;;  %269 = vmatpush.msra.mxu2 %v142_v2  ;;  %v126_v9 = vld [vmem:[#allocation5 + $0xf0] sm:$0xff]  ;;  %v157_v10 = vld [vmem:[#allocation5 + $0x1e8] sm:$0xff] }
  0x17   :  { %248 = vmatpush.msra.mxu1 %v127_v5  ;;  %229 = vmatpush.msra.mxu0 %v110_v4  ;;  %v140_v11 = vld [vmem:[#allocation5 + $0x160] sm:$0xff]  ;;  %v125_v13 = vld [vmem:[#allocation5 + $0xe8] sm:$0xff]  ;;  %v139_v16 = vld [vmem:[#allocation5 + $0x158] sm:$0xff] }
  0x18   :  { %289 = vmatpush.msra.mxu3 %v158_v7  ;;  %v108_v12 = vld [vmem:[#allocation5 + $0x60] sm:$0xff]  ;;  %270 = vmatpush.msra.mxu2 %v141_v6  ;;  %v107_v17 = vld [vmem:[#allocation5 + $0x58] sm:$0xff]  ;;  %v138_v20 = vld [vmem:[#allocation5 + $0x150] sm:$0xff] }
  0x19   :  { %249 = vmatpush.msra.mxu1 %v126_v9  ;;  %230 = vmatpush.msra.mxu0 %v109_v8  ;;  %v156_v14 = vld [vmem:[#allocation5 + $0x1e0] sm:$0xff]  ;;  %v155_v18 = vld [vmem:[#allocation5 + $0x1d8] sm:$0xff]  ;;  %v106_v21 = vld [vmem:[#allocation5 + $0x50] sm:$0xff] }
  0x1a   :  { %v124_v15 = vld [vmem:[#allocation5 + $0xe0] sm:$0xff]  ;;  %290 = vmatpush.msra.mxu3 %v157_v10  ;;  %271 = vmatpush.msra.mxu2 %v140_v11  ;;  %v123_v19 = vld [vmem:[#allocation5 + $0xd8] sm:$0xff]  ;;  %v154_v22 = vld [vmem:[#allocation5 + $0x1d0] sm:$0xff] }
  0x1b   :  { %250 = vmatpush.msra.mxu1 %v125_v13  ;;  %231 = vmatpush.msra.mxu0 %v108_v12  ;;  %v122_v23 = vld [vmem:[#allocation5 + $0xd0] sm:$0xff]  ;;  %v137_v24 = vld [vmem:[#allocation5 + $0x148] sm:$0xff]  ;;  %v136_v28 = vld [vmem:[#allocation5 + $0x140] sm:$0xff] }
  0x1c   :  { %291 = vmatpush.msra.mxu3 %v156_v14  ;;  %272 = vmatpush.msra.mxu2 %v139_v16  ;;  %v105_v25 = vld [vmem:[#allocation5 + $0x48] sm:$0xff]  ;;  %v104_v29 = vld [vmem:[#allocation5 + $0x40] sm:$0xff]  ;;  %v135_v32 = vld [vmem:[#allocation5 + $0x138] sm:$0xff] }
  0x1d   :  { %251 = vmatpush.msra.mxu1 %v124_v15  ;;  %232 = vmatpush.msra.mxu0 %v107_v17  ;;  %v153_v26 = vld [vmem:[#allocation5 + $0x1c8] sm:$0xff]  ;;  %v152_v30 = vld [vmem:[#allocation5 + $0x1c0] sm:$0xff]  ;;  %v103_v33 = vld [vmem:[#allocation5 + $0x38] sm:$0xff] }
  0x1e   :  { %292 = vmatpush.msra.mxu3 %v155_v18  ;;  %273 = vmatpush.msra.mxu2 %v138_v20  ;;  %v121_v27 = vld [vmem:[#allocation5 + $0xc8] sm:$0xff]  ;;  %v120_v31 = vld [vmem:[#allocation5 + $0xc0] sm:$0xff]  ;;  %v151_v34 = vld [vmem:[#allocation5 + $0x1b8] sm:$0xff] }
  0x1f   :  { %252 = vmatpush.msra.mxu1 %v123_v19  ;;  %233 = vmatpush.msra.mxu0 %v106_v21  ;;  %v119_v35 = vld [vmem:[#allocation5 + $0xb8] sm:$0xff]  ;;  %v134_v36 = vld [vmem:[#allocation5 + $0x130] sm:$0xff]  ;;  %v133_v40 = vld [vmem:[#allocation5 + $0x128] sm:$0xff] }
  0x20   :  { %293 = vmatpush.msra.mxu3 %v154_v22  ;;  %274 = vmatpush.msra.mxu2 %v137_v24  ;;  %v102_v37 = vld [vmem:[#allocation5 + $0x30] sm:$0xff]  ;;  %v101_v41 = vld [vmem:[#allocation5 + $0x28] sm:$0xff]  ;;  %v132_v44 = vld [vmem:[#allocation5 + $0x120] sm:$0xff] }
  0x21   :  { %253 = vmatpush.msra.mxu1 %v122_v23  ;;  %234 = vmatpush.msra.mxu0 %v105_v25  ;;  %v150_v38 = vld [vmem:[#allocation5 + $0x1b0] sm:$0xff]  ;;  %v149_v42 = vld [vmem:[#allocation5 + $0x1a8] sm:$0xff]  ;;  %v100_v45 = vld [vmem:[#allocation5 + $0x20] sm:$0xff] }
  0x22   :  { %294 = vmatpush.msra.mxu3 %v153_v26  ;;  %275 = vmatpush.msra.mxu2 %v136_v28  ;;  %v118_v39 = vld [vmem:[#allocation5 + $0xb0] sm:$0xff]  ;;  %v117_v43 = vld [vmem:[#allocation5 + $0xa8] sm:$0xff]  ;;  %v148_v46 = vld [vmem:[#allocation5 + $0x1a0] sm:$0xff] }
  0x23   :  { %254 = vmatpush.msra.mxu1 %v121_v27  ;;  %235 = vmatpush.msra.mxu0 %v104_v29  ;;  %v116_v47 = vld [vmem:[#allocation5 + $0xa0] sm:$0xff]  ;;  %v131_v48 = vld [vmem:[#allocation5 + $0x118] sm:$0xff]  ;;  %v130_v52 = vld [vmem:[#allocation5 + $0x110] sm:$0xff] }
  0x24   :  { %295 = vmatpush.msra.mxu3 %v152_v30  ;;  %276 = vmatpush.msra.mxu2 %v135_v32  ;;  %v99_v49 = vld [vmem:[#allocation5 + $0x18] sm:$0xff]  ;;  %v98_v53 = vld [vmem:[#allocation5 + $0x10] sm:$0xff]  ;;  %v129_v56 = vld [vmem:[#allocation5 + $0x108] sm:$0xff] }
  0x25   :  { %255 = vmatpush.msra.mxu1 %v120_v31  ;;  %236 = vmatpush.msra.mxu0 %v103_v33  ;;  %v147_v50 = vld [vmem:[#allocation5 + $0x198] sm:$0xff]  ;;  %v146_v54 = vld [vmem:[#allocation5 + $0x190] sm:$0xff]  ;;  %v97_v57 = vld [vmem:[#allocation5 + $0x8] sm:$0xff] }
  0x26   :  { %296 = vmatpush.msra.mxu3 %v151_v34  ;;  %277 = vmatpush.msra.mxu2 %v134_v36  ;;  %v115_v51 = vld [vmem:[#allocation5 + $0x98] sm:$0xff]  ;;  %v114_v55 = vld [vmem:[#allocation5 + $0x90] sm:$0xff]  ;;  %v145_v58 = vld [vmem:[#allocation5 + $0x188] sm:$0xff] }
  0x27   :  { %256 = vmatpush.msra.mxu1 %v119_v35  ;;  %237 = vmatpush.msra.mxu0 %v102_v37  ;;  %v113_v59 = vld [vmem:[#allocation5 + $0x88] sm:$0xff]  ;;  %v128_v60 = vld [vmem:[#allocation5 + $0x100] sm:$0xff]  ;;  %v207_v62 = vld [vmem:[#allocation5 + $0x378] sm:$0xff] }
  0x28   :  { %297 = vmatpush.msra.mxu3 %v150_v38  ;;  %278 = vmatpush.msra.mxu2 %v133_v40  ;;  %v96_v61 = vld [vmem:[#allocation5] sm:$0xff]  ;;  %v175_v0 = vld [vmem:[#allocation5 + $0x278] sm:$0xff]  ;;  %v206_v2 = vld [vmem:[#allocation5 + $0x370] sm:$0xff] }
  0x29   :  { %257 = vmatpush.msra.mxu1 %v118_v39  ;;  %238 = vmatpush.msra.mxu0 %v101_v41  ;;  %v144_v63 = vld [vmem:[#allocation5 + $0x180] sm:$0xff]  ;;  %v223_v1 = vld [vmem:[#allocation5 + $0x3f8] sm:$0xff]  ;;  %v174_v4 = vld [vmem:[#allocation5 + $0x270] sm:$0xff] }
  0x2a   :  { %298 = vmatpush.msra.mxu3 %v149_v42  ;;  %279 = vmatpush.msra.mxu2 %v132_v44  ;;  %v112_v3 = vld [vmem:[#allocation5 + $0x80] sm:$0xff]  ;;  %v191_v5 = vld [vmem:[#allocation5 + $0x2f8] sm:$0xff]  ;;  %v205_v6 = vld [vmem:[#allocation5 + $0x368] sm:$0xff] }
  0x2b   :  { %258 = vmatpush.msra.mxu1 %v117_v43  ;;  %239 = vmatpush.msra.mxu0 %v100_v45  ;;  %v222_v7 = vld [vmem:[#allocation5 + $0x3f0] sm:$0xff]  ;;  %v173_v8 = vld [vmem:[#allocation5 + $0x268] sm:$0xff]  ;;  %v204_v10 = vld [vmem:[#allocation5 + $0x360] sm:$0xff] }
  0x2c   :  { %299 = vmatpush.msra.mxu3 %v148_v46  ;;  %280 = vmatpush.msra.mxu2 %v131_v48  ;;  %v190_v9 = vld [vmem:[#allocation5 + $0x2f0] sm:$0xff]  ;;  %v221_v11 = vld [vmem:[#allocation5 + $0x3e8] sm:$0xff]  ;;  %v172_v12 = vld [vmem:[#allocation5 + $0x260] sm:$0xff] }
  0x2d   :  { %259 = vmatpush.msra.mxu1 %v116_v47  ;;  %240 = vmatpush.msra.mxu0 %v99_v49  ;;  %v189_v13 = vld [vmem:[#allocation5 + $0x2e8] sm:$0xff]  ;;  %v203_v14 = vld [vmem:[#allocation5 + $0x358] sm:$0xff]  ;;  %v220_v15 = vld [vmem:[#allocation5 + $0x3e0] sm:$0xff] }
  0x2e   :  { %300 = vmatpush.msra.mxu3 %v147_v50  ;;  %281 = vmatpush.msra.mxu2 %v130_v52  ;;  %v171_v16 = vld [vmem:[#allocation5 + $0x258] sm:$0xff]  ;;  %v188_v17 = vld [vmem:[#allocation5 + $0x2e0] sm:$0xff]  ;;  %v202_v18 = vld [vmem:[#allocation5 + $0x350] sm:$0xff] }
  0x2f   :  { %260 = vmatpush.msra.mxu1 %v115_v51  ;;  %241 = vmatpush.msra.mxu0 %v98_v53  ;;  %v219_v19 = vld [vmem:[#allocation5 + $0x3d8] sm:$0xff]  ;;  %v170_v20 = vld [vmem:[#allocation5 + $0x250] sm:$0xff]  ;;  %v201_v22 = vld [vmem:[#allocation5 + $0x348] sm:$0xff] }
  0x30   :  { %301 = vmatpush.msra.mxu3 %v146_v54  ;;  %282 = vmatpush.msra.mxu2 %v129_v56  ;;  %v187_v21 = vld [vmem:[#allocation5 + $0x2d8] sm:$0xff]  ;;  %v218_v23 = vld [vmem:[#allocation5 + $0x3d0] sm:$0xff]  ;;  %v169_v24 = vld [vmem:[#allocation5 + $0x248] sm:$0xff] }
  0x31   :  { %261 = vmatpush.msra.mxu1 %v114_v55  ;;  %242 = vmatpush.msra.mxu0 %v97_v57  ;;  %v186_v25 = vld [vmem:[#allocation5 + $0x2d0] sm:$0xff]  ;;  %v200_v26 = vld [vmem:[#allocation5 + $0x340] sm:$0xff]  ;;  %v217_v27 = vld [vmem:[#allocation5 + $0x3c8] sm:$0xff] }
  0x32   :  { %302 = vmatpush.msra.mxu3 %v145_v58  ;;  %283 = vmatpush.msra.mxu2 %v128_v60  ;;  %v168_v28 = vld [vmem:[#allocation5 + $0x240] sm:$0xff]  ;;  %v185_v29 = vld [vmem:[#allocation5 + $0x2c8] sm:$0xff]  ;;  %v199_v30 = vld [vmem:[#allocation5 + $0x338] sm:$0xff] }
  0x33   :  { %262 = vmatpush.msra.mxu1 %v113_v59  ;;  %243 = vmatpush.msra.mxu0 %v96_v61  ;;  %v216_v31 = vld [vmem:[#allocation5 + $0x3c0] sm:$0xff]  ;;  %v167_v32 = vld [vmem:[#allocation5 + $0x238] sm:$0xff]  ;;  %v198_v34 = vld [vmem:[#allocation5 + $0x330] sm:$0xff] }
  0x34   :  { %348 = vmatpush.msrb.mxu2 %v207_v62  ;;  %303 = vmatpush.msra.mxu3 %v144_v63  ;;  %v184_v33 = vld [vmem:[#allocation5 + $0x2c0] sm:$0xff]  ;;  %v215_v35 = vld [vmem:[#allocation5 + $0x3b8] sm:$0xff]  ;;  %v166_v36 = vld [vmem:[#allocation5 + $0x230] sm:$0xff] }
  0x35   :  { %308 = vmatpush.msrb.mxu0 %v175_v0  ;;  %263 = vmatpush.msra.mxu1 %v112_v3  ;;  %v183_v37 = vld [vmem:[#allocation5 + $0x2b8] sm:$0xff]  ;;  %v197_v38 = vld [vmem:[#allocation5 + $0x328] sm:$0xff]  ;;  %v214_v39 = vld [vmem:[#allocation5 + $0x3b0] sm:$0xff] }
  0x36   :  { %368 = vmatpush.msrb.mxu3 %v223_v1  ;;  %349 = vmatpush.msrb.mxu2 %v206_v2  ;;  %v165_v40 = vld [vmem:[#allocation5 + $0x228] sm:$0xff]  ;;  %v182_v41 = vld [vmem:[#allocation5 + $0x2b0] sm:$0xff]  ;;  %v196_v42 = vld [vmem:[#allocation5 + $0x320] sm:$0xff] }
  0x37   :  { %309 = vmatpush.msrb.mxu0 %v174_v4  ;;  %328 = vmatpush.msrb.mxu1 %v191_v5  ;;  %v213_v43 = vld [vmem:[#allocation5 + $0x3a8] sm:$0xff]  ;;  %v90_v44 = vld [vmem:[#allocation2 + $0x10] sm:$0xff]  ;;  %v164_v45 = vld [vmem:[#allocation5 + $0x220] sm:$0xff] }
  0x38   :  { %350 = vmatpush.msrb.mxu2 %v205_v6  ;;  %369 = vmatpush.msrb.mxu3 %v222_v7  ;;  %v181_v46 = vld [vmem:[#allocation5 + $0x2a8] sm:$0xff]  ;;  %v195_v47 = vld [vmem:[#allocation5 + $0x318] sm:$0xff]  ;;  %v212_v48 = vld [vmem:[#allocation5 + $0x3a0] sm:$0xff] }
  0x39   :  { %310 = vmatpush.msrb.mxu0 %v173_v8  ;;  %329 = vmatpush.msrb.mxu1 %v190_v9  ;;  %v88_v49 = vld [vmem:[#allocation2] sm:$0xff]  ;;  %v91_v50 = vld [vmem:[#allocation2 + $0x18] sm:$0xff]  ;;  %v194_v53 = vld [vmem:[#allocation5 + $0x310] sm:$0xff] }
  0x3a   :  { %351 = vmatpush.msrb.mxu2 %v204_v10  ;;  %370 = vmatpush.msrb.mxu3 %v221_v11  ;;  %v163_v51 = vld [vmem:[#allocation5 + $0x218] sm:$0xff]  ;;  %v180_v52 = vld [vmem:[#allocation5 + $0x2a0] sm:$0xff]  ;;  %v89_v55 = vld [vmem:[#allocation2 + $0x8] sm:$0xff] }
  0x3b   :  { %311 = vmatpush.msrb.mxu0 %v172_v12  ;;  %330 = vmatpush.msrb.mxu1 %v189_v13  ;;  %v211_v54 = vld [vmem:[#allocation5 + $0x398] sm:$0xff]  ;;  %v162_v56 = vld [vmem:[#allocation5 + $0x210] sm:$0xff]  ;;  %v193_v58 = vld [vmem:[#allocation5 + $0x308] sm:$0xff] }
  0x3c   :  { %352 = vmatpush.msrb.mxu2 %v203_v14  ;;  %371 = vmatpush.msrb.mxu3 %v220_v15  ;;  %v179_v57 = vld [vmem:[#allocation5 + $0x298] sm:$0xff]  ;;  %v210_v59 = vld [vmem:[#allocation5 + $0x390] sm:$0xff]  ;;  %v161_v60 = vld [vmem:[#allocation5 + $0x208] sm:$0xff] }
  0x3d   :  { %312 = vmatpush.msrb.mxu0 %v171_v16  ;;  %331 = vmatpush.msrb.mxu1 %v188_v17  ;;  %v178_v61 = vld [vmem:[#allocation5 + $0x290] sm:$0xff]  ;;  %v192_v62 = vld [vmem:[#allocation5 + $0x300] sm:$0xff]  ;;  %v209_v63 = vld [vmem:[#allocation5 + $0x388] sm:$0xff] }
  0x3e   :  { %353 = vmatpush.msrb.mxu2 %v202_v18  ;;  %372 = vmatpush.msrb.mxu3 %v219_v19  ;;  %v94_v0 = vld [vmem:[#allocation2 + $0x30] sm:$0xff]  ;;  %v160_v1 = vld [vmem:[#allocation5 + $0x200] sm:$0xff]  ;;  %v177_v2 = vld [vmem:[#allocation5 + $0x288] sm:$0xff] }
  0x3f   :  { %313 = vmatpush.msrb.mxu0 %v170_v20  ;;  %332 = vmatpush.msrb.mxu1 %v187_v21  ;;  %v208_v3 = vld [vmem:[#allocation5 + $0x380] sm:$0xff]  ;;  %v95_v5 = vld [vmem:[#allocation2 + $0x38] sm:$0xff]  ;;  %v93_v8 = vld [vmem:[#allocation2 + $0x28] sm:$0xff] }
  0x40   :  { %354 = vmatpush.msrb.mxu2 %v201_v22  ;;  %373 = vmatpush.msrb.mxu3 %v218_v23  ;;  %v92_v4 = vld [vmem:[#allocation2 + $0x20] sm:$0xff]  ;;  %v404_v7 = vld [vmem:[#allocation7 + $0x78] sm:$0xff]  ;;  %v403_v9 = vld [vmem:[#allocation7 + $0x70] sm:$0xff] }
  0x41   :  { %314 = vmatpush.msrb.mxu0 %v169_v24  ;;  %333 = vmatpush.msrb.mxu1 %v186_v25  ;;  %v176_v6 = vld [vmem:[#allocation5 + $0x280] sm:$0xff]  ;;  %v402_v10 = vld [vmem:[#allocation7 + $0x68] sm:$0xff]  ;;  %v400_v12 = vld [vmem:[#allocation7 + $0x58] sm:$0xff] }
  0x42   :  { %355 = vmatpush.msrb.mxu2 %v200_v26  ;;  %374 = vmatpush.msrb.mxu3 %v217_v27  ;;  %v401_v11 = vld [vmem:[#allocation7 + $0x60] sm:$0xff]  ;;  %v399_v13 = vld [vmem:[#allocation7 + $0x50] sm:$0xff]  ;;  %v398_v14 = vld [vmem:[#allocation7 + $0x48] sm:$0xff] }
  0x43   :  { %315 = vmatpush.msrb.mxu0 %v168_v28  ;;  %334 = vmatpush.msrb.mxu1 %v185_v29  ;;  %v397_v15 = vld [vmem:[#allocation7 + $0x40] sm:$0xff]  ;;  %v396_v16 = vld [vmem:[#allocation7 + $0x38] sm:$0xff]  ;;  %v395_v17 = vld [vmem:[#allocation7 + $0x30] sm:$0xff] }
  0x44   :  { %356 = vmatpush.msrb.mxu2 %v199_v30  ;;  %375 = vmatpush.msrb.mxu3 %v216_v31  ;;  %v394_v18 = vld [vmem:[#allocation7 + $0x28] sm:$0xff]  ;;  %v393_v19 = vld [vmem:[#allocation7 + $0x20] sm:$0xff]  ;;  %v392_v20 = vld [vmem:[#allocation7 + $0x18] sm:$0xff] }
  0x45   :  { %316 = vmatpush.msrb.mxu0 %v167_v32  ;;  %335 = vmatpush.msrb.mxu1 %v184_v33  ;;  %v391_v21 = vld [vmem:[#allocation7 + $0x10] sm:$0xff]  ;;  %v390_v22 = vld [vmem:[#allocation7 + $0x8] sm:$0xff]  ;;  %v389_v23 = vld [vmem:[#allocation7] sm:$0xff] }
  0x46   :  { %357 = vmatpush.msrb.mxu2 %v198_v34  ;;  %376 = vmatpush.msrb.mxu3 %v215_v35  ;;  %v445_v24 = vld [vmem:[#allocation8 + $0x78] sm:$0xff]  ;;  %v444_v25 = vld [vmem:[#allocation8 + $0x70] sm:$0xff]  ;;  %v443_v26 = vld [vmem:[#allocation8 + $0x68] sm:$0xff] }
  0x47   :  { %317 = vmatpush.msrb.mxu0 %v166_v36  ;;  %336 = vmatpush.msrb.mxu1 %v183_v37  ;;  %v442_v27 = vld [vmem:[#allocation8 + $0x60] sm:$0xff]  ;;  %v441_v28 = vld [vmem:[#allocation8 + $0x58] sm:$0xff]  ;;  %v440_v30 = vld [vmem:[#allocation8 + $0x50] sm:$0xff] }
  0x48   :  { %358 = vmatpush.msrb.mxu2 %v197_v38  ;;  %377 = vmatpush.msrb.mxu3 %v214_v39  ;;  %v516_v29 = vld [vmem:[%s724_s2] ss:$0 sm:$0xff]  ;;  %v439_v31 = vld [vmem:[#allocation8 + $0x48] sm:$0xff]  ;;  %v437_v36 = vld [vmem:[#allocation8 + $0x38] sm:$0xff] }
  0x49   :  { %318 = vmatpush.msrb.mxu0 %v165_v40  ;;  %337 = vmatpush.msrb.mxu1 %v182_v41  ;;  %v438_v34 = vld [vmem:[#allocation8 + $0x40] sm:$0xff]  ;;  %v436_v39 = vld [vmem:[#allocation8 + $0x30] sm:$0xff] }
  0x4a   :  { %359 = vmatpush.msrb.mxu2 %v196_v42  ;;  %378 = vmatpush.msrb.mxu3 %v213_v43  ;;  %v435_v42 = vld [vmem:[#allocation8 + $0x28] sm:$0xff] }
  0x4b   :  { %284 = vmatmul.f32.vlgmr.msra.gmra.mxu2 %v90_v44  ;;  %319 = vmatpush.msrb.mxu0 %v164_v45  ;;  %v434_v44 = vld [vmem:[#allocation8 + $0x20] sm:$0xff] }
  0x4c   :  { %338 = vmatpush.msrb.mxu1 %v181_v46  ;;  %360 = vmatpush.msrb.mxu2 %v195_v47  ;;  %v433_v47 = vld [vmem:[#allocation8 + $0x18] sm:$0xff] }
  0x4d   :  { %379 = vmatpush.msrb.mxu3 %v212_v48  ;;  %244 = vmatmul.f32.vlgmr.msra.gmra.mxu0 %v88_v49 }
  0x4e   :  { %304 = vmatmul.f32.vlgmr.msra.gmra.mxu3 %v91_v50  ;;  %320 = vmatpush.msrb.mxu0 %v163_v51 }
  0x4f   :  { %339 = vmatpush.msrb.mxu1 %v180_v52  ;;  %361 = vmatpush.msrb.mxu2 %v194_v53 }
  0x50   :  { %380 = vmatpush.msrb.mxu3 %v211_v54  ;;  %264 = vmatmul.f32.vlgmr.msra.gmra.mxu1 %v89_v55  ;;  %v432_v55 = vld [vmem:[#allocation8 + $0x10] sm:$0xff] }
  0x51   :  { %321 = vmatpush.msrb.mxu0 %v162_v56  ;;  %340 = vmatpush.msrb.mxu1 %v179_v57  ;;  %v431_v56 = vld [vmem:[#allocation8 + $0x8] sm:$0xff]  ;;  %v430_v57 = vld [vmem:[#allocation8] sm:$0xff] }
  0x52   :  { %362 = vmatpush.msrb.mxu2 %v193_v58  ;;  %381 = vmatpush.msrb.mxu3 %v210_v59  ;;  %v517_v58 = vld [vmem:[%s726_s4] ss:$0 sm:$0xff]  ;;  %s657_s4 = smov [#allocation10]  }
  0x53   :  { %322 = vmatpush.msrb.mxu0 %v161_v60  ;;  %341 = vmatpush.msrb.mxu1 %v178_v61 }
  0x54   :  { %363 = vmatpush.msrb.mxu2 %v192_v62  ;;  %382 = vmatpush.msrb.mxu3 %v209_v63  ;;  %v518_v62 = vld [vmem:[%s728_s6] ss:$0 sm:$0xff]  ;;  %s495_s6 = sshll.u32 %s657_s4, 4  ;;  %s496_s6 = int_to_ptr.vmem [resolvable:$true] %s495_s6 }
  0x55   :  { %364 = vmatmul.f32.vlgmr.msrb.gmra.mxu2 %v94_v0  ;;  %323 = vmatpush.msrb.mxu0 %v160_v1 }
  0x56   :  { %342 = vmatpush.msrb.mxu1 %v177_v2  ;;  %383 = vmatpush.msrb.mxu3 %v208_v3 }
  0x57   :  { %324 = vmatmul.f32.vlgmr.msrb.gmra.mxu0 %v92_v4  ;;  %384 = vmatmul.f32.vlgmr.msrb.gmra.mxu3 %v95_v5 }
  0x58   :  { %343 = vmatpush.msrb.mxu1 %v176_v6  ;;  %409 = vmatpush.msra.mxu0 %v404_v7  ;;  %v470_v7 = vlaneseq }
  0x59   :  { %344 = vmatmul.f32.vlgmr.msrb.gmra.mxu1 %v93_v8 }
  0x5a   :  { %410 = vmatpush.msra.mxu0 %v403_v9  ;;  %450 = vmatpush.msra.mxu1 %v445_v24 }
  0x5c   :  { %411 = vmatpush.msra.mxu0 %v402_v10  ;;  %451 = vmatpush.msra.mxu1 %v444_v25  ;;  %v471_v10 = vand.u32 127, %v470_v7 }
  0x5e   :  { %412 = vmatpush.msra.mxu0 %v401_v11  ;;  %452 = vmatpush.msra.mxu1 %v443_v26  ;;  %vm472_vm1 = vcmp.lt.s32.totalorder %v471_v10, 8 }
  0x60   :  { %413 = vmatpush.msra.mxu0 %v400_v12  ;;  %453 = vmatpush.msra.mxu1 %v442_v27 }
  0x62   :  { %414 = vmatpush.msra.mxu0 %v399_v13  ;;  %454 = vmatpush.msra.mxu1 %v441_v28 }
  0x64   :  { %415 = vmatpush.msra.mxu0 %v398_v14  ;;  %455 = vmatpush.msra.mxu1 %v440_v30 }
  0x66   :  { %416 = vmatpush.msra.mxu0 %v397_v15  ;;  %456 = vmatpush.msra.mxu1 %v439_v31 }
  0x68   :  { %417 = vmatpush.msra.mxu0 %v396_v16  ;;  %457 = vmatpush.msra.mxu1 %v438_v34 }
  0x6a   :  { %418 = vmatpush.msra.mxu0 %v395_v17  ;;  %458 = vmatpush.msra.mxu1 %v437_v36 }
  0x6c   :  { %419 = vmatpush.msra.mxu0 %v394_v18  ;;  %459 = vmatpush.msra.mxu1 %v436_v39 }
  0x6e   :  { %420 = vmatpush.msra.mxu0 %v393_v19  ;;  %460 = vmatpush.msra.mxu1 %v435_v42 }
  0x70   :  { %421 = vmatpush.msra.mxu0 %v392_v20  ;;  %461 = vmatpush.msra.mxu1 %v434_v44 }
  0x72   :  { %422 = vmatpush.msra.mxu0 %v391_v21  ;;  %462 = vmatpush.msra.mxu1 %v433_v47 }
  0x74   :  { %423 = vmatpush.msra.mxu0 %v390_v22  ;;  %463 = vmatpush.msra.mxu1 %v432_v55 }
  0x76   :  { %424 = vmatpush.msra.mxu0 %v389_v23  ;;  %464 = vmatpush.msra.mxu1 %v431_v56 }
  0x78   :  { %465 = vmatpush.msra.mxu1 %v430_v57 }
  0xca   :  { %v245_v32 = vpop.f32.mrf.mxu0 }
  0xcb   :  { %v246_v33 = vadd.f32 %v516_v29, %v245_v32 }
  0xcd   :  { %v265_v35 = vpop.f32.mrf.mxu1 }
  0xce   :  { %v266_v37 = vadd.f32 %v265_v35, %v246_v33  ;;  %v285_v38 = vpop.f32.mrf.mxu2 }
  0xd0   :  { %v286_v40 = vadd.f32 %v285_v38, %v266_v37 }
  0xd1   :  { %v305_v41 = vpop.f32.mrf.mxu3 }
  0xd2   :  { %v306_v43 = vadd.f32 %v305_v41, %v286_v40 }
  0xd4   :  { %v325_v45 = vpop.f32.mrf.mxu0 }
  0xd5   :  { %v326_v46 = vadd.f32 %v325_v45, %v306_v43 }
  0xd6   :  { %v345_v48 = vpop.f32.mrf.mxu1 }
  0xd7   :  { %v346_v49 = vadd.f32 %v345_v48, %v326_v46 }
  0xd8   :  { %v365_v50 = vpop.f32.mrf.mxu2 }
  0xd9   :  { %v366_v51 = vadd.f32 %v365_v50, %v346_v49 }
  0xda   :  { %v385_v52 = vpop.f32.mrf.mxu3 }
  0xdb   :  { %v386_v53 = vadd.f32 %v385_v52, %v366_v51 }
  0xdd   :  { %v388_v54 = vmax.f32 %v386_v53, 0.0 }
  0xdf   :  { %425 = vmatmul.f32.vlgmr.msra.gmra.mxu0 %v388_v54 }
 0x15c   :  { %v426_v59 = vpop.f32.mrf.mxu0 }
 0x15d   :  { %v427_v60 = vadd.f32 %v517_v58, %v426_v59 }
 0x15f   :  { %v429_v61 = vmax.f32 %v427_v60, 0.0 }
 0x161   :  { %466 = vmatmul.f32.vlgmr.msra.gmra.mxu1 %v429_v61 }
 0x1de   :  { %v467_v63 = vpop.f32.mrf.mxu1 }
 0x1df   :  { %v468_v0 = vadd.f32 %v518_v62, %v467_v63 }
 0x1e1   :  { %v474_v1 = vand.u32 2147483647, %v468_v0  ;;  %v473_v14 = vmax.f32 %v468_v0, 0.0 }
 0x1e3   :  { %v475_v2 = vsub.f32 0.0, %v474_v1 }
 0x1e5   :  { %v476_v3 = vmul.f32 1.442695, %v475_v2 }
 0x1e7   :  { %519 = vpow2.f32 %v476_v3 }
 0x1ed   :  { %v520_v4 = vpop.eup %519 }
 0x1ee   :  { %v478_v5 = vadd.f32 1.0, %v520_v4  ;;  %v481_v6 = vmul.f32 -0.5, %v520_v4  ;;  %v484_v9 = vand.u32 2147483647, %v520_v4 }
 0x1f0   :  { %521 = vlog2.f32 %v478_v5  ;;  %v482_v8 = vadd.f32 1.0, %v481_v6  ;;  %vm485_vm0 = vcmp.lt.f32.partialorder %v484_v9, 0.0004427343 }
 0x1f2   :  { %v483_v13 = vmul.f32 %v520_v4, %v482_v8 }
 0x1f6   :  { %v522_v11 = vpop.eup %521 }
 0x1f7   :  { %v480_v12 = vmul.f32 0.6931472, %v522_v11 }
 0x1f9   :  { %v486_v15 = vsel %vm485_vm0, %v483_v13, %v480_v12 }
 0x1fa   :  { %v487_v16 = vadd.f32 %v486_v15, %v473_v14 }
 0x1fc   :  { %v488_v17 = vsel %vm472_vm1, %v468_v0, %v487_v16 }
 0x1fd   :  { %489 = vst [vmem:[#allocation10] sm:$0xff] %v488_v17 }
 0x1fe   :  { %500 = dma.vmem_to_hbm [thread:$0]  %s496_s6, 128, %s498_s26, [#allocation4]  }
 0x1ff   :  { %649 = dma.done.wait [#allocation4], 128  }
 0x200   :  { %650 = vsyncadd [#allocation4], 4294967168 }
 0x201   :  { %505 = vsyncpa [#allocation3], 1 }
 0x202   :  { %506 = vsyncpa [#allocation6], 1 }
 0x203   :  { %507 = vsyncpa [#allocation9], 1 }
 0x204   :  { %508 = vsyncpa [#allocation4], 1 }

</bundles_post_ra>
